<compile_context>
chip_gen: v7x
topology: tpu7x:2x2x1
jax: 0.10.0
libtpu: 0.0.40
codegen_flags: <defaults>
</compile_context>

<pallas_src>
import itertools
import math

import numpy as np
import jax
import jax.numpy as jnp
from jax.experimental import pallas as pl
from jax.experimental.pallas import tpu as pltpu

# ---------------- configuration (small shapes consistent with the module) ----
N_CONST   = 4                         # n_constituents
P         = 6                         # params per constituent
NR        = N_CONST * (N_CONST - 1)   # 12 (== 2*P, required by forward)
HIDDEN    = 32
DE        = 5
DO        = 6
N_TARGETS = 2
SOFTMAX   = False

BATCH     = 256                       # batch rides the lane dim -> keep a multiple of 128

assert NR == 2 * P, "GraphNetnoSV.forward only type-checks when N*(N-1) == 2*P"


def _num_batch_blocks():
    """Grid size: 1 block on single-TC v5e/v6e, 2 parallel blocks on dual-TC v7x."""
    try:
        kind = jax.devices()[0].device_kind.lower()
    except Exception:
        return 1
    if "v7" in kind or "7x" in kind:
        return 2
    return 1


# ---------------------------- Pallas kernel ----------------------------------
def _make_kernel(bb, idx_lo, idx_hi):
    """bb: batch per grid step (multiple of 128); idx_lo/idx_hi: static 0/1-pattern
    of Rr split into its receiver/sender-row halves (unrolled at trace time)."""
    pb = P * bb          # lanes in one (receiver or sender) half of the relational stage

    def kernel(x_rel_ref, x_obj_ref,
               w_rs1_ref, b1_ref, w2_ref, b2_ref, w3_ref, b3_ref,
               wo1_ref, bo1_ref, wo2_ref, bo2_ref, wo3_ref, bo3_ref,
               wfc_ref, bfc_ref,
               out_ref, c_buf):

        def mm(a, b):
            return jnp.dot(a, b, preferred_element_type=jnp.float32)

        def relu(v):
            return jnp.maximum(v, 0.0)

        # --- relational MLP, receiver & sender fused ------------------------------
        # one matmul produces both branches: rows [0:H) receiver, [H:2H) sender
        pre = mm(w_rs1_ref[...], x_rel_ref[...])                      # (2H, P*bb)
        h = relu(jnp.concatenate([pre[:HIDDEN, :], pre[HIDDEN:, :]], axis=1)
                 + b1_ref[...])                                       # (H, 2*P*bb)
        h = relu(mm(w2_ref[...], h) + b2_ref[...])                    # (H/2, 2*P*bb)
        e = relu(mm(w3_ref[...], h) + b3_ref[...])                    # (De, 2*P*bb)

        # --- Ebar via 128-aligned lane-slice adds (O(B), no kron matrices) --------
        # --- staged with x^T into one scratch so fo1 is a single matmul -----------
        c_buf[0:P, :] = x_obj_ref[...]                                # rows [0:P)   = x^T
        for n in range(N_CONST):
            acc = None
            for p in idx_lo[n]:                                       # receiver rows of E
                sl = e[:, p * bb:(p + 1) * bb]
                acc = sl if acc is None else acc + sl
            for p in idx_hi[n]:                                       # sender rows of E
                sl = e[:, pb + p * bb:pb + (p + 1) * bb]
                acc = sl if acc is None else acc + sl
            if acc is None:
                acc = jnp.zeros((DE, bb), jnp.float32)
            c_buf[P:P + DE, n * bb:(n + 1) * bb] = acc                # rows [P:P+De) = Ebar

        # --- object MLP ------------------------------------------------------------
        c = relu(mm(wo1_ref[...], c_buf[...]) + bo1_ref[...])         # (H, N*bb)
        c = relu(mm(wo2_ref[...], c) + bo2_ref[...])                  # (H/2, N*bb)
        o = relu(mm(wo3_ref[...], c) + bo3_ref[...])                  # (Do, N*bb)

        # --- sum over constituents: aligned lane-slice adds -------------------------
        nsum = o[:, 0:bb]
        for n in range(1, N_CONST):
            nsum = nsum + o[:, n * bb:(n + 1) * bb]                   # (Do, bb)

        # --- fused fc_fixed1/2/3 (exact: no nonlinearity between them) --------------
        res = mm(wfc_ref[...], nsum) + bfc_ref[...]                   # (n_targets, bb)
        if SOFTMAX:
            res = jax.nn.softmax(res, axis=0)
        out_ref[...] = res                                            # lane-dense store

    return kernel


# ------------------------------ wrapper ---------------------------------------
def graphnet_forward(x, rr, rs, params):
    """x: (batch, P, N); params: 9 (W, b) pairs in PyTorch (out_features, in_features) layout."""
    p32 = [(jnp.asarray(w, jnp.float32), jnp.asarray(b, jnp.float32)) for (w, b) in params]
    ((wfr1, bfr1), (wfr2, bfr2), (wfr3, bfr3),
     (wfo1, bfo1), (wfo2, bfo2), (wfo3, bfo3),
     (wfc1, bfc1), (wfc2, bfc2), (wfc3, bfc3)) = p32
    rr = jnp.asarray(rr, jnp.float32)
    rs = jnp.asarray(rs, jnp.float32)
    x = jnp.asarray(x, jnp.float32)
    batch = x.shape[0]

    # generation-dependent grid: 1 block (v5e/v6e) or 2 parallel blocks (v7x)
    g = _num_batch_blocks()
    if batch % (g * 128) != 0:
        g = 1
    bb = batch // g
    assert bb % 128 == 0, "batch block must keep the lane dimension 128-aligned"

    # fold Rr/Rs into the first relational layer and stack receiver/sender (exact)
    w_rs1 = jnp.concatenate([wfr1 @ rr.T, wfr1 @ rs.T], axis=0)          # (2H, N)
    # fuse the three bias-only fc layers (exact; softmax would come after)
    w_fc = wfc3 @ wfc2 @ wfc1                                            # (n_targets, Do)
    b_fc = wfc3 @ (wfc2 @ bfc1[:, None] + bfc2[:, None]) + bfc3[:, None]  # (n_targets, 1)

    weights = [
        w_rs1, bfr1[:, None],
        wfr2,  bfr2[:, None],
        wfr3,  bfr3[:, None],
        wfo1,  bfo1[:, None],
        wfo2,  bfo2[:, None],
        wfo3,  bfo3[:, None],
        w_fc,  b_fc,
    ]

    # x in the two "column" orientations, pre-blocked over the grid (host-side glue)
    x4 = x.reshape(g, bb, P, N_CONST)
    x_rel = jnp.transpose(x4, (0, 3, 2, 1)).reshape(g, N_CONST, P * bb)   # [i, n, p*bb+j]
    x_obj = jnp.transpose(x4, (0, 2, 3, 1)).reshape(g, P, N_CONST * bb)   # [i, p, n*bb+j]

    # static receiver/sender index sets (Rr is a constant 0/1 matrix)
    rr_np = np.asarray(rr)
    idx_lo = [tuple(int(p) for p in np.nonzero(rr_np[n, :P])[0]) for n in range(N_CONST)]
    idx_hi = [tuple(int(p) for p in np.nonzero(rr_np[n, P:])[0]) for n in range(N_CONST)]

    kernel = _make_kernel(bb, idx_lo, idx_hi)

    def _wspec(shape):
        # constant index map -> weight stays VMEM-resident across grid steps
        return pl.BlockSpec(shape, lambda i: (0, 0))

    in_specs = (
        [pl.BlockSpec((None, N_CONST, P * bb), lambda i: (i, 0, 0)),
         pl.BlockSpec((None, P, N_CONST * bb), lambda i: (i, 0, 0))]
        + [_wspec(w.shape) for w in weights]
    )
    out_spec = pl.BlockSpec((N_TARGETS, bb), lambda i: (0, i))

    out_t = pl.pallas_call(
        kernel,
        out_shape=jax.ShapeDtypeStruct((N_TARGETS, batch), jnp.float32),
        grid_spec=pltpu.PrefetchScalarGridSpec(
            num_scalar_prefetch=0,
            grid=(g,),
            in_specs=in_specs,
            out_specs=out_spec,
            scratch_shapes=[pltpu.VMEM((P + DE, N_CONST * bb), jnp.float32)]),
        compiler_params=pltpu.CompilerParams(
            dimension_semantics=("parallel",)),
    )(x_rel, x_obj, *weights)

    return out_t.T                                                      # (batch, n_targets)


# -------------------------- pure-JAX reference --------------------------------
def reference_forward(x, rr, rs, params):
    def lin(v, w, b):
        return v @ w.T + b

    def tmul(a, y):  # mirrors GraphNetnoSV.tmul
        s = a.shape
        return (a.reshape(-1, s[2]) @ y).reshape(-1, s[1], y.shape[1])

    ((wfr1, bfr1), (wfr2, bfr2), (wfr3, bfr3),
     (wfo1, bfo1), (wfo2, bfo2), (wfo3, bfo3),
     (wfc1, bfc1), (wfc2, bfc2), (wfc3, bfc3)) = params

    orr = tmul(x, rr)
    ors = tmul(x, rs)
    B = jnp.concatenate([orr, ors], axis=1)
    B = jax.nn.relu(lin(B, wfr1, bfr1))
    B = jax.nn.relu(lin(B, wfr2, bfr2))
    E = jax.nn.relu(lin(B, wfr3, bfr3))
    E = jnp.transpose(E, (0, 2, 1))
    ebar = tmul(E, rr.T)
    C = jnp.concatenate([x, ebar], axis=1)
    C = jnp.transpose(C, (0, 2, 1)).reshape(-1, P + DE)
    C = jax.nn.relu(lin(C, wfo1, bfo1))
    C = jax.nn.relu(lin(C, wfo2, bfo2))
    O = jax.nn.relu(lin(C, wfo3, bfo3)).reshape(-1, N_CONST, DO)
    Ns = jnp.sum(O, axis=1)
    Ns = lin(Ns, wfc1, bfc1)
    Ns = lin(Ns, wfc2, bfc2)
    Ns = lin(Ns, wfc3, bfc3)
    if SOFTMAX:
        Ns = jax.nn.softmax(Ns, axis=1)
    return Ns


# ------------------------------ setup -----------------------------------------
def make_assign_matrices():
    rr = np.zeros((N_CONST, NR), np.float32)
    rs = np.zeros((N_CONST, NR), np.float32)
    pairs = [p for p in itertools.product(range(N_CONST), range(N_CONST)) if p[0] != p[1]]
    for i, (r, s) in enumerate(pairs):
        rr[r, i] = 1.0
        rs[s, i] = 1.0
    return jnp.asarray(rr), jnp.asarray(rs)


def make_linear(key, out_f, in_f):
    k1, k2 = jax.random.split(key)
    bound = 1.0 / math.sqrt(in_f)
    w = jax.random.uniform(k1, (out_f, in_f), jnp.float32, -bound, bound)
    b = jax.random.uniform(k2, (out_f,), jnp.float32, -bound, bound)
    return w, b


if __name__ == "__main__":
    key = jax.random.PRNGKey(0)
    keys = jax.random.split(key, 10)

    # parameters (PyTorch nn.Linear shapes); fr*_pv layers are unused in forward.
    params = [
        make_linear(keys[0], HIDDEN, 2 * P),                  # fr1
        make_linear(keys[1], HIDDEN // 2, HIDDEN),            # fr2
        make_linear(keys[2], DE, HIDDEN // 2),                # fr3
        make_linear(keys[3], HIDDEN, P + DE),                 # fo1
        make_linear(keys[4], HIDDEN // 2, HIDDEN),            # fo2
        make_linear(keys[5], DO, HIDDEN // 2),                # fo3
        make_linear(keys[6], 5 * N_TARGETS, DO),              # fc_fixed1
        make_linear(keys[7], 3 * N_TARGETS, 5 * N_TARGETS),   # fc_fixed2
        make_linear(keys[8], N_TARGETS, 3 * N_TARGETS),       # fc_fixed3
    ]

    rr, rs = make_assign_matrices()
    x = jax.random.normal(keys[9], (BATCH, P, N_CONST), jnp.float32)

    out = graphnet_forward(x, rr, rs, params)
    out = jax.block_until_ready(out)

    ref = reference_forward(x, rr, rs, params)
    np.testing.assert_allclose(np.asarray(out), np.asarray(ref), rtol=1e-3, atol=1e-4)

    print("KERNEL_OK")
</pallas_src>

<mosaic_0001>
module attributes {stable_mosaic.version = 11 : i64} {
  func.func @kernel(%arg0: i32, %arg1: memref<1x4x1536xf32, #tpu.memory_space<vmem>>, %arg2: memref<1x6x1024xf32, #tpu.memory_space<vmem>>, %arg3: memref<64x4xf32, #tpu.memory_space<vmem>>, %arg4: memref<32x1xf32, #tpu.memory_space<vmem>>, %arg5: memref<16x32xf32, #tpu.memory_space<vmem>>, %arg6: memref<16x1xf32, #tpu.memory_space<vmem>>, %arg7: memref<5x16xf32, #tpu.memory_space<vmem>>, %arg8: memref<5x1xf32, #tpu.memory_space<vmem>>, %arg9: memref<32x11xf32, #tpu.memory_space<vmem>>, %arg10: memref<32x1xf32, #tpu.memory_space<vmem>>, %arg11: memref<16x32xf32, #tpu.memory_space<vmem>>, %arg12: memref<16x1xf32, #tpu.memory_space<vmem>>, %arg13: memref<6x16xf32, #tpu.memory_space<vmem>>, %arg14: memref<6x1xf32, #tpu.memory_space<vmem>>, %arg15: memref<2x6xf32, #tpu.memory_space<vmem>>, %arg16: memref<2x1xf32, #tpu.memory_space<vmem>>, %arg17: memref<2x256xf32, #tpu.memory_space<vmem>>, %arg18: memref<11x1024xf32, #tpu.memory_space<vmem>>) attributes {dimension_semantics = [#tpu.dimension_semantics<parallel>], iteration_bounds = array<i64: 1>, scalar_prefetch = 0 : i64, scratch_operands = 1 : i64, tpu.core_type = #tpu.core_type<tc>, window_params = [{transform_indices = @transform_0, window_bounds = array<i64: 1, 4, 1536>}, {transform_indices = @transform_1, window_bounds = array<i64: 1, 6, 1024>}, {pipeline_mode = #tpu.pipeline_mode<synchronous>, transform_indices = @transform_2, window_bounds = array<i64: 64, 4>}, {pipeline_mode = #tpu.pipeline_mode<synchronous>, transform_indices = @transform_3, window_bounds = array<i64: 32, 1>}, {pipeline_mode = #tpu.pipeline_mode<synchronous>, transform_indices = @transform_4, window_bounds = array<i64: 16, 32>}, {pipeline_mode = #tpu.pipeline_mode<synchronous>, transform_indices = @transform_5, window_bounds = array<i64: 16, 1>}, {pipeline_mode = #tpu.pipeline_mode<synchronous>, transform_indices = @transform_6, window_bounds = array<i64: 5, 16>}, {pipeline_mode = #tpu.pipeline_mode<synchronous>, transform_indices = @transform_7, window_bounds = array<i64: 5, 1>}, {pipeline_mode = #tpu.pipeline_mode<synchronous>, transform_indices = @transform_8, window_bounds = array<i64: 32, 11>}, {pipeline_mode = #tpu.pipeline_mode<synchronous>, transform_indices = @transform_9, window_bounds = array<i64: 32, 1>}, {pipeline_mode = #tpu.pipeline_mode<synchronous>, transform_indices = @transform_10, window_bounds = array<i64: 16, 32>}, {pipeline_mode = #tpu.pipeline_mode<synchronous>, transform_indices = @transform_11, window_bounds = array<i64: 16, 1>}, {pipeline_mode = #tpu.pipeline_mode<synchronous>, transform_indices = @transform_12, window_bounds = array<i64: 6, 16>}, {pipeline_mode = #tpu.pipeline_mode<synchronous>, transform_indices = @transform_13, window_bounds = array<i64: 6, 1>}, {pipeline_mode = #tpu.pipeline_mode<synchronous>, transform_indices = @transform_14, window_bounds = array<i64: 2, 6>}, {pipeline_mode = #tpu.pipeline_mode<synchronous>, transform_indices = @transform_15, window_bounds = array<i64: 2, 1>}, {transform_indices = @transform_16, window_bounds = array<i64: 2, 256>}]} {
    %c0 = arith.constant 0 : index
    %c0_0 = arith.constant 0 : index
    %0 = vector.load %arg3[%c0, %c0_0] : memref<64x4xf32, #tpu.memory_space<vmem>>, vector<64x4xf32>
    %c0_1 = arith.constant 0 : index
    %c0_2 = arith.constant 0 : index
    %c0_3 = arith.constant 0 : index
    %1 = vector.load %arg1[%c0_1, %c0_2, %c0_3] : memref<1x4x1536xf32, #tpu.memory_space<vmem>>, vector<1x4x1536xf32>
    %2 = vector.shape_cast %1 : vector<1x4x1536xf32> to vector<4x1536xf32>
    %cst = arith.constant dense<0.000000e+00> : vector<64x1536xf32>
    %3 = tpu.matmul %0, %2, %cst {dimension_numbers = #tpu.dot_dimension_numbers<[1], [0], [0], [1], [0, 0, 1, 1], [], []>} : vector<64x4xf32>, vector<4x1536xf32>, vector<64x1536xf32> -> vector<64x1536xf32>
    %4 = vector.extract_strided_slice %3 {offsets = [0, 0], sizes = [32, 1536], strides = [1, 1]} : vector<64x1536xf32> to vector<32x1536xf32>
    %5 = vector.extract_strided_slice %3 {offsets = [32, 0], sizes = [32, 1536], strides = [1, 1]} : vector<64x1536xf32> to vector<32x1536xf32>
    %6 = tpu.concatenate %4, %5 in 1 : vector<32x1536xf32>, vector<32x1536xf32> -> vector<32x3072xf32>
    %c0_4 = arith.constant 0 : index
    %c0_5 = arith.constant 0 : index
    %7 = vector.load %arg4[%c0_4, %c0_5] : memref<32x1xf32, #tpu.memory_space<vmem>>, vector<32x1xf32>
    %8 = vector.broadcast %7 : vector<32x1xf32> to vector<32x3072xf32>
    %9 = arith.addf %6, %8 : vector<32x3072xf32>
    %cst_6 = arith.constant 0.000000e+00 : f32
    %10 = vector.broadcast %cst_6 : f32 to vector<32x3072xf32>
    %11 = arith.maximumf %9, %10 : vector<32x3072xf32>
    %c0_7 = arith.constant 0 : index
    %c0_8 = arith.constant 0 : index
    %12 = vector.load %arg5[%c0_7, %c0_8] : memref<16x32xf32, #tpu.memory_space<vmem>>, vector<16x32xf32>
    %cst_9 = arith.constant dense<0.000000e+00> : vector<16x3072xf32>
    %13 = tpu.matmul %12, %11, %cst_9 {dimension_numbers = #tpu.dot_dimension_numbers<[1], [0], [0], [1], [0, 0, 1, 1], [], []>} : vector<16x32xf32>, vector<32x3072xf32>, vector<16x3072xf32> -> vector<16x3072xf32>
    %c0_10 = arith.constant 0 : index
    %c0_11 = arith.constant 0 : index
    %14 = vector.load %arg6[%c0_10, %c0_11] : memref<16x1xf32, #tpu.memory_space<vmem>>, vector<16x1xf32>
    %15 = vector.broadcast %14 : vector<16x1xf32> to vector<16x3072xf32>
    %16 = arith.addf %13, %15 : vector<16x3072xf32>
    %cst_12 = arith.constant 0.000000e+00 : f32
    %17 = vector.broadcast %cst_12 : f32 to vector<16x3072xf32>
    %18 = arith.maximumf %16, %17 : vector<16x3072xf32>
    %c0_13 = arith.constant 0 : index
    %c0_14 = arith.constant 0 : index
    %19 = vector.load %arg7[%c0_13, %c0_14] : memref<5x16xf32, #tpu.memory_space<vmem>>, vector<5x16xf32>
    %cst_15 = arith.constant dense<0.000000e+00> : vector<5x3072xf32>
    %20 = tpu.matmul %19, %18, %cst_15 {dimension_numbers = #tpu.dot_dimension_numbers<[1], [0], [0], [1], [0, 0, 1, 1], [], []>} : vector<5x16xf32>, vector<16x3072xf32>, vector<5x3072xf32> -> vector<5x3072xf32>
    %c0_16 = arith.constant 0 : index
    %c0_17 = arith.constant 0 : index
    %21 = vector.load %arg8[%c0_16, %c0_17] : memref<5x1xf32, #tpu.memory_space<vmem>>, vector<5x1xf32>
    %22 = vector.broadcast %21 : vector<5x1xf32> to vector<5x3072xf32>
    %23 = arith.addf %20, %22 : vector<5x3072xf32>
    %cst_18 = arith.constant 0.000000e+00 : f32
    %24 = vector.broadcast %cst_18 : f32 to vector<5x3072xf32>
    %25 = arith.maximumf %23, %24 : vector<5x3072xf32>
    %c0_19 = arith.constant 0 : index
    %c0_20 = arith.constant 0 : index
    %c0_21 = arith.constant 0 : index
    %26 = vector.load %arg2[%c0_19, %c0_20, %c0_21] : memref<1x6x1024xf32, #tpu.memory_space<vmem>>, vector<1x6x1024xf32>
    %27 = vector.shape_cast %26 : vector<1x6x1024xf32> to vector<6x1024xf32>
    %c0_22 = arith.constant 0 : index
    %c0_23 = arith.constant 0 : index
    %28 = vector.load %arg18[%c0_22, %c0_23] : memref<11x1024xf32, #tpu.memory_space<vmem>>, vector<6x1024xf32>
    tpu.vector_store %arg18[%c0_22, %c0_23], %27 {strides = array<i32>} : memref<11x1024xf32, #tpu.memory_space<vmem>>, vector<6x1024xf32>,
    %29 = vector.extract_strided_slice %25 {offsets = [0, 0], sizes = [5, 256], strides = [1, 1]} : vector<5x3072xf32> to vector<5x256xf32>
    %30 = vector.extract_strided_slice %25 {offsets = [0, 256], sizes = [5, 256], strides = [1, 1]} : vector<5x3072xf32> to vector<5x256xf32>
    %31 = arith.addf %29, %30 : vector<5x256xf32>
    %32 = vector.extract_strided_slice %25 {offsets = [0, 512], sizes = [5, 256], strides = [1, 1]} : vector<5x3072xf32> to vector<5x256xf32>
    %33 = arith.addf %31, %32 : vector<5x256xf32>
    %c6 = arith.constant 6 : index
    %c0_24 = arith.constant 0 : index
    %34 = vector.load %arg18[%c6, %c0_24] : memref<11x1024xf32, #tpu.memory_space<vmem>>, vector<5x256xf32>
    tpu.vector_store %arg18[%c6, %c0_24], %33 {strides = array<i32>} : memref<11x1024xf32, #tpu.memory_space<vmem>>, vector<5x256xf32>,
    %35 = vector.extract_strided_slice %25 {offsets = [0, 768], sizes = [5, 256], strides = [1, 1]} : vector<5x3072xf32> to vector<5x256xf32>
    %36 = vector.extract_strided_slice %25 {offsets = [0, 1024], sizes = [5, 256], strides = [1, 1]} : vector<5x3072xf32> to vector<5x256xf32>
    %37 = arith.addf %35, %36 : vector<5x256xf32>
    %38 = vector.extract_strided_slice %25 {offsets = [0, 1280], sizes = [5, 256], strides = [1, 1]} : vector<5x3072xf32> to vector<5x256xf32>
    %39 = arith.addf %37, %38 : vector<5x256xf32>
    %c6_25 = arith.constant 6 : index
    %c256 = arith.constant 256 : index
    %40 = vector.load %arg18[%c6_25, %c256] : memref<11x1024xf32, #tpu.memory_space<vmem>>, vector<5x256xf32>
    tpu.vector_store %arg18[%c6_25, %c256], %39 {strides = array<i32>} : memref<11x1024xf32, #tpu.memory_space<vmem>>, vector<5x256xf32>,
    %41 = vector.extract_strided_slice %25 {offsets = [0, 1536], sizes = [5, 256], strides = [1, 1]} : vector<5x3072xf32> to vector<5x256xf32>
    %42 = vector.extract_strided_slice %25 {offsets = [0, 1792], sizes = [5, 256], strides = [1, 1]} : vector<5x3072xf32> to vector<5x256xf32>
    %43 = arith.addf %41, %42 : vector<5x256xf32>
    %44 = vector.extract_strided_slice %25 {offsets = [0, 2048], sizes = [5, 256], strides = [1, 1]} : vector<5x3072xf32> to vector<5x256xf32>
    %45 = arith.addf %43, %44 : vector<5x256xf32>
    %c6_26 = arith.constant 6 : index
    %c512 = arith.constant 512 : index
    %46 = vector.load %arg18[%c6_26, %c512] : memref<11x1024xf32, #tpu.memory_space<vmem>>, vector<5x256xf32>
    tpu.vector_store %arg18[%c6_26, %c512], %45 {strides = array<i32>} : memref<11x1024xf32, #tpu.memory_space<vmem>>, vector<5x256xf32>,
    %47 = vector.extract_strided_slice %25 {offsets = [0, 2304], sizes = [5, 256], strides = [1, 1]} : vector<5x3072xf32> to vector<5x256xf32>
    %48 = vector.extract_strided_slice %25 {offsets = [0, 2560], sizes = [5, 256], strides = [1, 1]} : vector<5x3072xf32> to vector<5x256xf32>
    %49 = arith.addf %47, %48 : vector<5x256xf32>
    %50 = vector.extract_strided_slice %25 {offsets = [0, 2816], sizes = [5, 256], strides = [1, 1]} : vector<5x3072xf32> to vector<5x256xf32>
    %51 = arith.addf %49, %50 : vector<5x256xf32>
    %c6_27 = arith.constant 6 : index
    %c768 = arith.constant 768 : index
    %52 = vector.load %arg18[%c6_27, %c768] : memref<11x1024xf32, #tpu.memory_space<vmem>>, vector<5x256xf32>
    tpu.vector_store %arg18[%c6_27, %c768], %51 {strides = array<i32>} : memref<11x1024xf32, #tpu.memory_space<vmem>>, vector<5x256xf32>,
    %c0_28 = arith.constant 0 : index
    %c0_29 = arith.constant 0 : index
    %53 = vector.load %arg9[%c0_28, %c0_29] : memref<32x11xf32, #tpu.memory_space<vmem>>, vector<32x11xf32>
    %c0_30 = arith.constant 0 : index
    %c0_31 = arith.constant 0 : index
    %54 = vector.load %arg18[%c0_30, %c0_31] : memref<11x1024xf32, #tpu.memory_space<vmem>>, vector<11x1024xf32>
    %cst_32 = arith.constant dense<0.000000e+00> : vector<32x1024xf32>
    %55 = tpu.matmul %53, %54, %cst_32 {dimension_numbers = #tpu.dot_dimension_numbers<[1], [0], [0], [1], [0, 0, 1, 1], [], []>} : vector<32x11xf32>, vector<11x1024xf32>, vector<32x1024xf32> -> vector<32x1024xf32>
    %c0_33 = arith.constant 0 : index
    %c0_34 = arith.constant 0 : index
    %56 = vector.load %arg10[%c0_33, %c0_34] : memref<32x1xf32, #tpu.memory_space<vmem>>, vector<32x1xf32>
    %57 = vector.broadcast %56 : vector<32x1xf32> to vector<32x1024xf32>
    %58 = arith.addf %55, %57 : vector<32x1024xf32>
    %cst_35 = arith.constant 0.000000e+00 : f32
    %59 = vector.broadcast %cst_35 : f32 to vector<32x1024xf32>
    %60 = arith.maximumf %58, %59 : vector<32x1024xf32>
    %c0_36 = arith.constant 0 : index
    %c0_37 = arith.constant 0 : index
    %61 = vector.load %arg11[%c0_36, %c0_37] : memref<16x32xf32, #tpu.memory_space<vmem>>, vector<16x32xf32>
    %cst_38 = arith.constant dense<0.000000e+00> : vector<16x1024xf32>
    %62 = tpu.matmul %61, %60, %cst_38 {dimension_numbers = #tpu.dot_dimension_numbers<[1], [0], [0], [1], [0, 0, 1, 1], [], []>} : vector<16x32xf32>, vector<32x1024xf32>, vector<16x1024xf32> -> vector<16x1024xf32>
    %c0_39 = arith.constant 0 : index
    %c0_40 = arith.constant 0 : index
    %63 = vector.load %arg12[%c0_39, %c0_40] : memref<16x1xf32, #tpu.memory_space<vmem>>, vector<16x1xf32>
    %64 = vector.broadcast %63 : vector<16x1xf32> to vector<16x1024xf32>
    %65 = arith.addf %62, %64 : vector<16x1024xf32>
    %cst_41 = arith.constant 0.000000e+00 : f32
    %66 = vector.broadcast %cst_41 : f32 to vector<16x1024xf32>
    %67 = arith.maximumf %65, %66 : vector<16x1024xf32>
    %c0_42 = arith.constant 0 : index
    %c0_43 = arith.constant 0 : index
    %68 = vector.load %arg13[%c0_42, %c0_43] : memref<6x16xf32, #tpu.memory_space<vmem>>, vector<6x16xf32>
    %cst_44 = arith.constant dense<0.000000e+00> : vector<6x1024xf32>
    %69 = tpu.matmul %68, %67, %cst_44 {dimension_numbers = #tpu.dot_dimension_numbers<[1], [0], [0], [1], [0, 0, 1, 1], [], []>} : vector<6x16xf32>, vector<16x1024xf32>, vector<6x1024xf32> -> vector<6x1024xf32>
    %c0_45 = arith.constant 0 : index
    %c0_46 = arith.constant 0 : index
    %70 = vector.load %arg14[%c0_45, %c0_46] : memref<6x1xf32, #tpu.memory_space<vmem>>, vector<6x1xf32>
    %71 = vector.broadcast %70 : vector<6x1xf32> to vector<6x1024xf32>
    %72 = arith.addf %69, %71 : vector<6x1024xf32>
    %cst_47 = arith.constant 0.000000e+00 : f32
    %73 = vector.broadcast %cst_47 : f32 to vector<6x1024xf32>
    %74 = arith.maximumf %72, %73 : vector<6x1024xf32>
    %75 = vector.extract_strided_slice %74 {offsets = [0, 0], sizes = [6, 256], strides = [1, 1]} : vector<6x1024xf32> to vector<6x256xf32>
    %76 = vector.extract_strided_slice %74 {offsets = [0, 256], sizes = [6, 256], strides = [1, 1]} : vector<6x1024xf32> to vector<6x256xf32>
    %77 = arith.addf %75, %76 : vector<6x256xf32>
    %78 = vector.extract_strided_slice %74 {offsets = [0, 512], sizes = [6, 256], strides = [1, 1]} : vector<6x1024xf32> to vector<6x256xf32>
    %79 = arith.addf %77, %78 : vector<6x256xf32>
    %80 = vector.extract_strided_slice %74 {offsets = [0, 768], sizes = [6, 256], strides = [1, 1]} : vector<6x1024xf32> to vector<6x256xf32>
    %81 = arith.addf %79, %80 : vector<6x256xf32>
    %c0_48 = arith.constant 0 : index
    %c0_49 = arith.constant 0 : index
    %82 = vector.load %arg15[%c0_48, %c0_49] : memref<2x6xf32, #tpu.memory_space<vmem>>, vector<2x6xf32>
    %cst_50 = arith.constant dense<0.000000e+00> : vector<2x256xf32>
    %83 = tpu.matmul %82, %81, %cst_50 {dimension_numbers = #tpu.dot_dimension_numbers<[1], [0], [0], [1], [0, 0, 1, 1], [], []>} : vector<2x6xf32>, vector<6x256xf32>, vector<2x256xf32> -> vector<2x256xf32>
    %c0_51 = arith.constant 0 : index
    %c0_52 = arith.constant 0 : index
    %84 = vector.load %arg16[%c0_51, %c0_52] : memref<2x1xf32, #tpu.memory_space<vmem>>, vector<2x1xf32>
    %85 = vector.broadcast %84 : vector<2x1xf32> to vector<2x256xf32>
    %86 = arith.addf %83, %85 : vector<2x256xf32>
    %c0_53 = arith.constant 0 : index
    %c0_54 = arith.constant 0 : index
    %87 = vector.load %arg17[%c0_53, %c0_54] : memref<2x256xf32, #tpu.memory_space<vmem>>, vector<2x256xf32>
    tpu.vector_store %arg17[%c0_53, %c0_54], %86 {strides = array<i32>} : memref<2x256xf32, #tpu.memory_space<vmem>>, vector<2x256xf32>,
    return
  }
  func.func @transform_0(%arg0: i32) -> (i32, i32, i32) {
    %c0_i32 = arith.constant 0 : i32
    %c0_i32_0 = arith.constant 0 : i32
    %c0_i32_1 = arith.constant 0 : i32
    return %arg0, %c0_i32, %c0_i32_0 : i32, i32, i32
  }
  func.func @transform_1(%arg0: i32) -> (i32, i32, i32) {
    %c0_i32 = arith.constant 0 : i32
    %c0_i32_0 = arith.constant 0 : i32
    %c0_i32_1 = arith.constant 0 : i32
    return %arg0, %c0_i32, %c0_i32_0 : i32, i32, i32
  }
  func.func @transform_2(%arg0: i32) -> (i32, i32) {
    %c0_i32 = arith.constant 0 : i32
    %c0_i32_0 = arith.constant 0 : i32
    %c0_i32_1 = arith.constant 0 : i32
    return %c0_i32, %c0_i32_0 : i32, i32
  }
  func.func @transform_3(%arg0: i32) -> (i32, i32) {
    %c0_i32 = arith.constant 0 : i32
    %c0_i32_0 = arith.constant 0 : i32
    %c0_i32_1 = arith.constant 0 : i32
    return %c0_i32, %c0_i32_0 : i32, i32
  }
  func.func @transform_4(%arg0: i32) -> (i32, i32) {
    %c0_i32 = arith.constant 0 : i32
    %c0_i32_0 = arith.constant 0 : i32
    %c0_i32_1 = arith.constant 0 : i32
    return %c0_i32, %c0_i32_0 : i32, i32
  }
  func.func @transform_5(%arg0: i32) -> (i32, i32) {
    %c0_i32 = arith.constant 0 : i32
    %c0_i32_0 = arith.constant 0 : i32
    %c0_i32_1 = arith.constant 0 : i32
    return %c0_i32, %c0_i32_0 : i32, i32
  }
  func.func @transform_6(%arg0: i32) -> (i32, i32) {
    %c0_i32 = arith.constant 0 : i32
    %c0_i32_0 = arith.constant 0 : i32
    %c0_i32_1 = arith.constant 0 : i32
    return %c0_i32, %c0_i32_0 : i32, i32
  }
  func.func @transform_7(%arg0: i32) -> (i32, i32) {
    %c0_i32 = arith.constant 0 : i32
    %c0_i32_0 = arith.constant 0 : i32
    %c0_i32_1 = arith.constant 0 : i32
    return %c0_i32, %c0_i32_0 : i32, i32
  }
  func.func @transform_8(%arg0: i32) -> (i32, i32) {
    %c0_i32 = arith.constant 0 : i32
    %c0_i32_0 = arith.constant 0 : i32
    %c0_i32_1 = arith.constant 0 : i32
    return %c0_i32, %c0_i32_0 : i32, i32
  }
  func.func @transform_9(%arg0: i32) -> (i32, i32) {
    %c0_i32 = arith.constant 0 : i32
    %c0_i32_0 = arith.constant 0 : i32
    %c0_i32_1 = arith.constant 0 : i32
    return %c0_i32, %c0_i32_0 : i32, i32
  }
  func.func @transform_10(%arg0: i32) -> (i32, i32) {
    %c0_i32 = arith.constant 0 : i32
    %c0_i32_0 = arith.constant 0 : i32
    %c0_i32_1 = arith.constant 0 : i32
    return %c0_i32, %c0_i32_0 : i32, i32
  }
  func.func @transform_11(%arg0: i32) -> (i32, i32) {
    %c0_i32 = arith.constant 0 : i32
    %c0_i32_0 = arith.constant 0 : i32
    %c0_i32_1 = arith.constant 0 : i32
    return %c0_i32, %c0_i32_0 : i32, i32
  }
  func.func @transform_12(%arg0: i32) -> (i32, i32) {
    %c0_i32 = arith.constant 0 : i32
    %c0_i32_0 = arith.constant 0 : i32
    %c0_i32_1 = arith.constant 0 : i32
    return %c0_i32, %c0_i32_0 : i32, i32
  }
  func.func @transform_13(%arg0: i32) -> (i32, i32) {
    %c0_i32 = arith.constant 0 : i32
    %c0_i32_0 = arith.constant 0 : i32
    %c0_i32_1 = arith.constant 0 : i32
    return %c0_i32, %c0_i32_0 : i32, i32
  }
  func.func @transform_14(%arg0: i32) -> (i32, i32) {
    %c0_i32 = arith.constant 0 : i32
    %c0_i32_0 = arith.constant 0 : i32
    %c0_i32_1 = arith.constant 0 : i32
    return %c0_i32, %c0_i32_0 : i32, i32
  }
  func.func @transform_15(%arg0: i32) -> (i32, i32) {
    %c0_i32 = arith.constant 0 : i32
    %c0_i32_0 = arith.constant 0 : i32
    %c0_i32_1 = arith.constant 0 : i32
    return %c0_i32, %c0_i32_0 : i32, i32
  }
  func.func @transform_16(%arg0: i32) -> (i32, i32) {
    %c0_i32 = arith.constant 0 : i32
    %c0_i32_0 = arith.constant 0 : i32
    return %c0_i32, %arg0 : i32, i32
  }
}

</mosaic_0001>

<bundles_post_ra>
// kernel: tpu_custom_call.1
= control target key start
LH: loop header
LB: loop body
LE: loop exit
PB: predicated region body
PF: predicated region fallthrough
CT: control target
= control target key end

     0   :  { %s5525_s0 = inlined_call_operand.vmem [shape: f32[1,4,1536], index: 0, kind: input, shape index: {}]   ;;  %s5526_s1 = inlined_call_operand.vmem [shape: f32[1,6,1024], index: 1, kind: input, shape index: {}]   ;;  %s5527_s2 = inlined_call_operand.vmem [shape: f32[64,4], index: 2, kind: input, shape index: {}]   ;;  %s5528_s3 = inlined_call_operand.vmem [shape: f32[32,1], index: 3, kind: input, shape index: {}]   ;;  %s5529_s4 = inlined_call_operand.vmem [shape: f32[16,32], index: 4, kind: input, shape index: {}]   ;;  %s5530_s5 = inlined_call_operand.vmem [shape: f32[16,1], index: 5, kind: input, shape index: {}]   ;;  %s5531_s6 = inlined_call_operand.vmem [shape: f32[5,16], index: 6, kind: input, shape index: {}]   ;;  %s5532_s7 = inlined_call_operand.vmem [shape: f32[5,1], index: 7, kind: input, shape index: {}]   ;;  %s5533_s8 = inlined_call_operand.vmem [shape: f32[32,11], index: 8, kind: input, shape index: {}]   ;;  %s5534_s9 = inlined_call_operand.vmem [shape: f32[32,1], index: 9, kind: input, shape index: {}]   ;;  %s5535_s10 = inlined_call_operand.vmem [shape: f32[16,32], index: 10, kind: input, shape index: {}]   ;;  %s5536_s11 = inlined_call_operand.vmem [shape: f32[16,1], index: 11, kind: input, shape index: {}]   ;;  %s5537_s12 = inlined_call_operand.vmem [shape: f32[6,16], index: 12, kind: input, shape index: {}]   ;;  %s5538_s13 = inlined_call_operand.vmem [shape: f32[6,1], index: 13, kind: input, shape index: {}]   ;;  %s5539_s14 = inlined_call_operand.vmem [shape: f32[2,6], index: 14, kind: input, shape index: {}]   ;;  %s5540_s15 = inlined_call_operand.vmem [shape: f32[2,1], index: 15, kind: input, shape index: {}]   ;;  %s5541_s16 = inlined_call_operand.hbm [shape: f32[2,256], index: 16, kind: output, shape index: {}]  }
   0x1   :  { %5543 = sst [smem:[#allocation6_spill]] %s5525_s0 }
   0x2   :  { %s5544_s23 = sld [smem:[#allocation6_spill]]  ;;  %vm105_vm0 = vcmask 1043456   ;;  %v4601_v4 = vmov 0.0   ;;  %v4701_v5 = vld [vmem:[%s5527_s2] sm:$0xff]  ;;  %vm80_vm1 = vcmask 31744   ;;  %v4602_v8 = vmov 0  }
   0x3   :  { %194 = vmatprep.mubr.f32.mxu0 %v4601_v4  ;;  %307 = vmatprep.mubr.f32.mxu1 %v4601_v4  ;;  %v4732_v13 = vld [vmem:[%s5527_s2 + $0x8] sm:$0xff]  ;;  %v808_v16 = vld [vmem:[%s5528_s3] sm:$0xff]  ;;  %v810_v17 = vld [vmem:[%s5528_s3 + $0x10] sm:$0xff] }
   0x4   :  { %4569 = vset.pattern.permute.xlu0 %v4602_v8  ;;  %4570 = vset.pattern.permute.xlu1 %v4602_v8 }
   0x8   :  { %v62_v0 = vld [vmem:[%s5544_s23] sm:$0xff]  ;;  %v63_v1 = vld [vmem:[%s5544_s23 + $0x8] sm:$0xff]  ;;  %v64_v6 = vld [vmem:[%s5544_s23 + $0x10] sm:$0xff] }
   0x9   :  { %v74_v2 = vcombine.high %v62_v0, %v62_v0  ;;  %v75_v3 = vcombine.high %v63_v1, %v63_v1  ;;  %v65_v7 = vld [vmem:[%s5544_s23 + $0x18] sm:$0xff]  ;;  %v76_v9 = vcombine.high %v64_v6, %v64_v6  ;;  %v4716_v11 = vld [vmem:[%s5544_s23 + $0x20] sm:$0xff]  ;;  %v4721_v12 = vld [vmem:[%s5544_s23 + $0x28] sm:$0xff] }
   0xa   :  { %v77_v10 = vcombine.high %v65_v7, %v65_v7  ;;  %v78_v14 = vcombine.high %v4716_v11, %v4716_v11  ;;  %v79_v15 = vcombine.high %v4721_v12, %v4721_v12 }
   0xb   :  { %4213 = vmatprep.subr.msk.mxu0 %vm105_vm0, %v74_v2  ;;  %4223 = vmatprep.subr.msk.mxu1 %vm105_vm0, %v75_v3 }
   0xc   :  { %4214 = vmatpush1.msk.msra.mxu0 %vm105_vm0, %v62_v0  ;;  %4224 = vmatpush1.msk.msra.mxu1 %vm105_vm0, %v63_v1 }
   0xd   :  { %4215 = vmatmul.mubr.msk.f32.vlgmr.msra.gmra.mrb[0].mxu0 %vm80_vm1, %v4701_v5  ;;  %4225 = vmatmul.mubr.msk.f32.vlgmr.msra.gmra.mrb[0].mxu1 %vm80_vm1, %v4701_v5 }
   0xe   :  { %200 = vmatprep.mubr.f32.mxu0 %v4601_v4  ;;  %313 = vmatprep.mubr.f32.mxu1 %v4601_v4 }
   0xf   :  { %4233 = vmatprep.subr.msk.mxu0 %vm105_vm0, %v76_v9  ;;  %4243 = vmatprep.subr.msk.mxu1 %vm105_vm0, %v77_v10 }
  0x10   :  { %4234 = vmatpush1.msk.msra.mxu0 %vm105_vm0, %v64_v6  ;;  %4244 = vmatpush1.msk.msra.mxu1 %vm105_vm0, %v65_v7 }
  0x11   :  { %4216 = vmatmul.mubr.msk.f32.gmra.mrb[2].mxu0 %vm80_vm1, %v4732_v13  ;;  %4226 = vmatmul.mubr.msk.f32.gmra.mrb[2].mxu1 %vm80_vm1, %v4732_v13 }
  0x12   :  { %21 = vsyncpa [#allocation4], 0  ;;  %206 = vmatprep.mubr.f32.mxu0 %v4601_v4  ;;  %319 = vmatprep.mubr.f32.mxu1 %v4601_v4  ;;  %v4757_v18 = vld [vmem:[%s5527_s2 + $0x10] sm:$0xff]  ;;  %v809_v19 = vld [vmem:[%s5528_s3 + $0x8] sm:$0xff]  ;;  %vm1038_vm2 = vcmask 261120   ;;  %vm2024_vm3 = vcmask 130048  }
  0x13   :  { %4253 = vmatprep.subr.msk.mxu0 %vm105_vm0, %v78_v14  ;;  %4263 = vmatprep.subr.msk.mxu1 %vm105_vm0, %v79_v15  ;;  %v811_v20 = vld [vmem:[%s5528_s3 + $0x18] sm:$0xff]  ;;  %v1026_v22 = vld [vmem:[%s5530_s5] sm:$0xff]  ;;  %v1027_v23 = vld [vmem:[%s5530_s5 + $0x8] sm:$0xff]  ;;  %vm3033_vm4 = vcmask 1042432   ;;  %vm4603_vm5 = vmmov 1   ;;  %vm3020_vm7 = vcmask 89088  }
  0x14   :  { %814 = vperm.xlu0 %4569, %v808_v16   ;;  %824 = vperm.xlu1 %4570, %v810_v17   ;;  %v4776_v21 = vld [vmem:[%s5527_s2 + $0x18] sm:$0xff]  ;;  %v4793_v24 = vld [vmem:[%s5527_s2 + $0x20] sm:$0xff]  ;;  %v4810_v27 = vld [vmem:[%s5527_s2 + $0x28] sm:$0xff]  ;;  %vm4109_vm8 = vcmask 1045504   ;;  %vm4105_vm9 = vcmask 48128   ;;  %s4604_s0 = smov [#allocation3]  }
  0x15   :  { %4217 = vmatmul.mubr.msk.f32.gmra.mrb[4].mxu0 %vm80_vm1, %v4757_v18  ;;  %4227 = vmatmul.mubr.msk.f32.gmra.mrb[4].mxu1 %vm80_vm1, %v4757_v18  ;;  %v2018_v25 = vld [vmem:[%s5532_s7] sm:$0x1f]  ;;  %v2997_v28 = vld [vmem:[%s5534_s9 + $0x8] sm:$0xff]  ;;  %v2998_v29 = vld [vmem:[%s5534_s9 + $0x10] sm:$0xff]  ;;  %s4205_s17 = sshll.u32 %s4604_s0, 4  ;;  %s4206_s17 = int_to_ptr.vmem [resolvable:$true] %s4205_s17 }
  0x16   :  { %212 = vmatprep.mubr.f32.mxu0 %v4601_v4  ;;  %325 = vmatprep.mubr.f32.mxu1 %v4601_v4  ;;  %v2996_v26 = vld [vmem:[%s5534_s9] sm:$0xff]  ;;  %v4827_v30 = vld [vmem:[%s5527_s2 + $0x30] sm:$0xff]  ;;  %v2999_v31 = vld [vmem:[%s5534_s9 + $0x18] sm:$0xff]  ;;  %s4577_s18 = scalar_lea.vmem %s4206_s17, 64  ;;  %p4582_p1 = scmp.lt.s32.totalorder %s4206_s17, %s4206_s17 }
  0x17   :  { %v3448_v32 = vld [vmem:[%s5536_s11] sm:$0xff]  ;;  %v4844_v33 = vld [vmem:[%s5527_s2 + $0x38] sm:$0xff]  ;;  %v3449_v34 = vld [vmem:[%s5536_s11 + $0x8] sm:$0xff]  ;;  %p4578_p0 = scmp.ne.s32.totalorder %s4206_s17, %s4577_s18  ;;  %p4583_p2 = scmp.lt.s32.totalorder %s4577_s18, %s4577_s18 }
  0x18   :  { %819 = vperm.xlu0 %4569, %v809_v19   ;;  %829 = vperm.xlu1 %4570, %v811_v20   ;;  %v3791_v35 = vld [vmem:[%s5538_s13] sm:$0x3f]  ;;  %vm5320_vm6 = vmpackc.low %vm3033_vm4, %vm4603_vm5 }
  0x19   :  { %4218 = vmatmul.mubr.msk.f32.gmra.mrb[6].mxu0 %vm80_vm1, %v4776_v21  ;;  %4228 = vmatmul.mubr.msk.f32.gmra.mrb[6].mxu1 %vm80_vm1, %v4776_v21  ;;  %v4099_v36 = vld [vmem:[%s5540_s15] sm:$0x3]  ;;  %p4584_p3 = por %p4583_p2, %p4582_p1 }
  0x1a   :  { %218 = vmatprep.mubr.f32.mxu0 %v4601_v4  ;;  %331 = vmatprep.mubr.f32.mxu1 %v4601_v4 }
  0x1b   :  { %p4585_p4 = pnand %p4584_p3, %p4578_p0 }
  0x1c   :  { %1030 = vperm.xlu0 %4569, %v1026_v22   ;;  %1035 = vperm.xlu1 %4570, %v1027_v23  }
  0x1d   :  { %4219 = vmatmul.mubr.msk.f32.gmra.mrb[8].mxu0 %vm80_vm1, %v4793_v24  ;;  %4229 = vmatmul.mubr.msk.f32.gmra.mrb[8].mxu1 %vm80_vm1, %v4793_v24 }
  0x1e   :  { %224 = vmatprep.mubr.f32.mxu0 %v4601_v4  ;;  %337 = vmatprep.mubr.f32.mxu1 %v4601_v4 }
  0x20   :  { %2021 = vperm.xlu0 %4569, %v2018_v25   ;;  %3002 = vperm.xlu1 %4570, %v2996_v26  }
  0x21   :  { %4220 = vmatmul.mubr.msk.f32.gmra.mrb[10].mxu0 %vm80_vm1, %v4810_v27  ;;  %4230 = vmatmul.mubr.msk.f32.gmra.mrb[10].mxu1 %vm80_vm1, %v4810_v27 }
  0x22   :  { %230 = vmatprep.mubr.f32.mxu0 %v4601_v4  ;;  %343 = vmatprep.mubr.f32.mxu1 %v4601_v4 }
  0x24   :  { %3007 = vperm.xlu0 %4569, %v2997_v28   ;;  %3012 = vperm.xlu1 %4570, %v2998_v29  }
  0x25   :  { %4221 = vmatmul.mubr.msk.f32.gmra.mrb[12].mxu0 %vm80_vm1, %v4827_v30  ;;  %4231 = vmatmul.mubr.msk.f32.gmra.mrb[12].mxu1 %vm80_vm1, %v4827_v30 }
  0x26   :  { %236 = vmatprep.mubr.f32.mxu0 %v4601_v4  ;;  %349 = vmatprep.mubr.f32.mxu1 %v4601_v4 }
  0x28   :  { %3017 = vperm.xlu0 %4569, %v2999_v31   ;;  %3452 = vperm.xlu1 %4570, %v3448_v32  }
  0x29   :  { %4222 = vmatmul.mubr.msk.f32.gmra.mrb[14].mxu0 %vm80_vm1, %v4844_v33  ;;  %4232 = vmatmul.mubr.msk.f32.gmra.mrb[14].mxu1 %vm80_vm1, %v4844_v33 }
  0x2a   :  { %420 = vmatprep.mubr.f32.mxu0 %v4601_v4  ;;  %533 = vmatprep.mubr.f32.mxu1 %v4601_v4 }
  0x2c   :  { %3457 = vperm.xlu0 %4569, %v3449_v34   ;;  %3794 = vperm.xlu1 %4570, %v3791_v35  }
  0x2d   :  { %4235 = vmatmul.mubr.msk.f32.vlgmr.msra.gmra.mrb[16].mxu0 %vm80_vm1, %v4701_v5  ;;  %4245 = vmatmul.mubr.msk.f32.vlgmr.msra.gmra.mrb[16].mxu1 %vm80_vm1, %v4701_v5 }
  0x2e   :  { %426 = vmatprep.mubr.f32.mxu0 %v4601_v4  ;;  %539 = vmatprep.mubr.f32.mxu1 %v4601_v4 }
  0x2f   :  { %4254 = vmatpush1.msk.msra.mxu0 %vm105_vm0, %v4716_v11  ;;  %4264 = vmatpush1.msk.msra.mxu1 %vm105_vm0, %v4721_v12 }
  0x30   :  { %4102 = vperm.xlu0 %4569, %v4099_v36  }
  0x31   :  { %4236 = vmatmul.mubr.msk.f32.gmra.mrb[18].mxu0 %vm80_vm1, %v4732_v13  ;;  %4246 = vmatmul.mubr.msk.f32.gmra.mrb[18].mxu1 %vm80_vm1, %v4732_v13 }
  0x32   :  { %432 = vmatprep.mubr.f32.mxu0 %v4601_v4  ;;  %545 = vmatprep.mubr.f32.mxu1 %v4601_v4 }
  0x35   :  { %4237 = vmatmul.mubr.msk.f32.gmra.mrb[20].mxu0 %vm80_vm1, %v4757_v18  ;;  %4247 = vmatmul.mubr.msk.f32.gmra.mrb[20].mxu1 %vm80_vm1, %v4757_v18 }
  0x36   :  { %438 = vmatprep.mubr.f32.mxu0 %v4601_v4  ;;  %551 = vmatprep.mubr.f32.mxu1 %v4601_v4 }
  0x39   :  { %4238 = vmatmul.mubr.msk.f32.gmra.mrb[22].mxu0 %vm80_vm1, %v4776_v21  ;;  %4248 = vmatmul.mubr.msk.f32.gmra.mrb[22].mxu1 %vm80_vm1, %v4776_v21 }
  0x3a   :  { %444 = vmatprep.mubr.f32.mxu0 %v4601_v4  ;;  %557 = vmatprep.mubr.f32.mxu1 %v4601_v4 }
  0x3d   :  { %4239 = vmatmul.mubr.msk.f32.gmra.mrb[24].mxu0 %vm80_vm1, %v4793_v24  ;;  %4249 = vmatmul.mubr.msk.f32.gmra.mrb[24].mxu1 %vm80_vm1, %v4793_v24 }
  0x3e   :  { %450 = vmatprep.mubr.f32.mxu0 %v4601_v4  ;;  %563 = vmatprep.mubr.f32.mxu1 %v4601_v4 }
  0x41   :  { %4240 = vmatmul.mubr.msk.f32.gmra.mrb[26].mxu0 %vm80_vm1, %v4810_v27  ;;  %4250 = vmatmul.mubr.msk.f32.gmra.mrb[26].mxu1 %vm80_vm1, %v4810_v27 }
  0x42   :  { %456 = vmatprep.mubr.f32.mxu0 %v4601_v4  ;;  %569 = vmatprep.mubr.f32.mxu1 %v4601_v4 }
  0x45   :  { %4241 = vmatmul.mubr.msk.f32.gmra.mrb[28].mxu0 %vm80_vm1, %v4827_v30  ;;  %4251 = vmatmul.mubr.msk.f32.gmra.mrb[28].mxu1 %vm80_vm1, %v4827_v30 }
  0x46   :  { %462 = vmatprep.mubr.f32.mxu0 %v4601_v4  ;;  %575 = vmatprep.mubr.f32.mxu1 %v4601_v4 }
  0x49   :  { %4242 = vmatmul.mubr.msk.f32.gmra.mrb[30].mxu0 %vm80_vm1, %v4844_v33  ;;  %4252 = vmatmul.mubr.msk.f32.gmra.mrb[30].mxu1 %vm80_vm1, %v4844_v33 }
  0x4a   :  { %646 = vmatprep.mubr.f32.mxu0 %v4601_v4  ;;  %759 = vmatprep.mubr.f32.mxu1 %v4601_v4 }
  0x4d   :  { %4255 = vmatmul.mubr.msk.f32.vlgmr.msra.gmra.mrb[32].mxu0 %vm80_vm1, %v4701_v5  ;;  %4265 = vmatmul.mubr.msk.f32.vlgmr.msra.gmra.mrb[32].mxu1 %vm80_vm1, %v4701_v5 }
  0x4e   :  { %652 = vmatprep.mubr.f32.mxu0 %v4601_v4  ;;  %765 = vmatprep.mubr.f32.mxu1 %v4601_v4 }
  0x51   :  { %4256 = vmatmul.mubr.msk.f32.gmra.mrb[34].mxu0 %vm80_vm1, %v4732_v13  ;;  %4266 = vmatmul.mubr.msk.f32.gmra.mrb[34].mxu1 %vm80_vm1, %v4732_v13 }
  0x52   :  { %658 = vmatprep.mubr.f32.mxu0 %v4601_v4  ;;  %771 = vmatprep.mubr.f32.mxu1 %v4601_v4 }
  0x55   :  { %4257 = vmatmul.mubr.msk.f32.gmra.mrb[36].mxu0 %vm80_vm1, %v4757_v18  ;;  %4267 = vmatmul.mubr.msk.f32.gmra.mrb[36].mxu1 %vm80_vm1, %v4757_v18 }
  0x56   :  { %664 = vmatprep.mubr.f32.mxu0 %v4601_v4  ;;  %777 = vmatprep.mubr.f32.mxu1 %v4601_v4 }
  0x59   :  { %4258 = vmatmul.mubr.msk.f32.gmra.mrb[38].mxu0 %vm80_vm1, %v4776_v21  ;;  %4268 = vmatmul.mubr.msk.f32.gmra.mrb[38].mxu1 %vm80_vm1, %v4776_v21 }
  0x5a   :  { %670 = vmatprep.mubr.f32.mxu0 %v4601_v4  ;;  %783 = vmatprep.mubr.f32.mxu1 %v4601_v4 }
  0x5d   :  { %4259 = vmatmul.mubr.msk.f32.gmra.mrb[40].mxu0 %vm80_vm1, %v4793_v24  ;;  %4269 = vmatmul.mubr.msk.f32.gmra.mrb[40].mxu1 %vm80_vm1, %v4793_v24 }
  0x5e   :  { %676 = vmatprep.mubr.f32.mxu0 %v4601_v4  ;;  %789 = vmatprep.mubr.f32.mxu1 %v4601_v4 }
  0x61   :  { %4260 = vmatmul.mubr.msk.f32.gmra.mrb[42].mxu0 %vm80_vm1, %v4810_v27  ;;  %4270 = vmatmul.mubr.msk.f32.gmra.mrb[42].mxu1 %vm80_vm1, %v4810_v27 }
  0x62   :  { %682 = vmatprep.mubr.f32.mxu0 %v4601_v4  ;;  %795 = vmatprep.mubr.f32.mxu1 %v4601_v4 }
  0x65   :  { %4261 = vmatmul.mubr.msk.f32.gmra.mrb[44].mxu0 %vm80_vm1, %v4827_v30  ;;  %4271 = vmatmul.mubr.msk.f32.gmra.mrb[44].mxu1 %vm80_vm1, %v4827_v30 }
  0x66   :  { %688 = vmatprep.mubr.f32.mxu0 %v4601_v4  ;;  %801 = vmatprep.mubr.f32.mxu1 %v4601_v4 }
  0x69   :  { %4262 = vmatmul.mubr.msk.f32.gmra.mrb[46].mxu0 %vm80_vm1, %v4844_v33  ;;  %4272 = vmatmul.mubr.msk.f32.gmra.mrb[46].mxu1 %vm80_vm1, %v4844_v33 }
  0x6a   :  { %1109 = vmatprep.mubr.f32.mxu0 %v4601_v4  ;;  %1186 = vmatprep.mubr.f32.mxu1 %v4601_v4 }
  0x93   :  { %v4961_v37 = vpop.permute.xlu0 %814  ;;  %v4967_v45 = vpop.permute.xlu1 %824 }
  0x97   :  { %v4963_v42 = vpop.permute.xlu0 %819  ;;  %v4975_v9 = vpop.permute.xlu1 %829 }
  0xe0   :  { %v196_v38 = vpop.f32.mrb[0].mxu0  ;;  %v309_v39 = vpop.f32.mrb[0].mxu1 }
  0xe1   :  { %v198_v40 = vpop.f32.mrb[1].mxu0  ;;  %v311_v41 = vpop.f32.mrb[1].mxu1  ;;  %v832_v43 = vadd.f32 %v4961_v37, %v196_v38  ;;  %v834_v44 = vadd.f32 %v4961_v37, %v309_v39 }
  0xe2   :  { %v833_v46 = vadd.f32 %v4961_v37, %v198_v40  ;;  %v835_v47 = vadd.f32 %v4961_v37, %v311_v41 }
  0xe3   :  { %v928_v56 = vmax.f32 %v832_v43, 0.0  ;;  %v930_v57 = vmax.f32 %v834_v44, 0.0 }
  0xe4   :  { %v202_v48 = vpop.f32.mrb[2].mxu0  ;;  %v315_v49 = vpop.f32.mrb[2].mxu1  ;;  %v929_v60 = vmax.f32 %v833_v46, 0.0  ;;  %v931_v61 = vmax.f32 %v835_v47, 0.0 }
  0xe5   :  { %v856_v50 = vadd.f32 %v4963_v42, %v202_v48  ;;  %v858_v51 = vadd.f32 %v4963_v42, %v315_v49  ;;  %v204_v52 = vpop.f32.mrb[3].mxu0  ;;  %v317_v53 = vpop.f32.mrb[3].mxu1 }
  0xe6   :  { %v857_v54 = vadd.f32 %v4963_v42, %v204_v52  ;;  %v859_v55 = vadd.f32 %v4963_v42, %v317_v53 }
  0xe7   :  { %v952_v58 = vmax.f32 %v856_v50, 0.0  ;;  %v954_v59 = vmax.f32 %v858_v51, 0.0  ;;  %v4994_v51 = vld [vmem:[%s5529_s4] sm:$0xff] }
  0xe8   :  { %v953_v62 = vmax.f32 %v857_v54, 0.0  ;;  %v955_v63 = vmax.f32 %v859_v55, 0.0  ;;  %v208_v0 = vpop.f32.mrb[4].mxu0  ;;  %v321_v1 = vpop.f32.mrb[4].mxu1 }
  0xe9   :  { %v4351_v2 = vpack.c.bf16 %v952_v58, %v928_v56  ;;  %v4359_v3 = vpack.c.bf16 %v954_v59, %v930_v57  ;;  %v210_v5 = vpop.f32.mrb[5].mxu0  ;;  %v323_v6 = vpop.f32.mrb[5].mxu1  ;;  %v880_v10 = vadd.f32 %v4967_v45, %v208_v0  ;;  %v882_v11 = vadd.f32 %v4967_v45, %v321_v1 }
  0xea   :  { %v4349_v7 = vpack.c.bf16 %v953_v62, %v929_v60  ;;  %v4357_v8 = vpack.c.bf16 %v955_v63, %v931_v61  ;;  %v881_v12 = vadd.f32 %v4967_v45, %v210_v5  ;;  %v883_v13 = vadd.f32 %v4967_v45, %v323_v6  ;;  %v5010_v5 = vld [vmem:[%s5529_s4 + $0x8] sm:$0xff] }
  0xeb   :  { %v976_v22 = vmax.f32 %v880_v10, 0.0  ;;  %v978_v23 = vmax.f32 %v882_v11, 0.0 }
  0xec   :  { %v214_v14 = vpop.f32.mrb[6].mxu0  ;;  %v327_v15 = vpop.f32.mrb[6].mxu1  ;;  %4350 = vmatprep.subr.bf16.mxu0 %v4349_v7  ;;  %4358 = vmatprep.subr.bf16.mxu1 %v4357_v8  ;;  %v977_v26 = vmax.f32 %v881_v12, 0.0  ;;  %v979_v27 = vmax.f32 %v883_v13, 0.0 }
  0xed   :  { %v904_v16 = vadd.f32 %v4975_v9, %v214_v14  ;;  %v906_v17 = vadd.f32 %v4975_v9, %v327_v15  ;;  %v216_v18 = vpop.f32.mrb[7].mxu0  ;;  %v329_v19 = vpop.f32.mrb[7].mxu1  ;;  %4352 = vmatpush1.bf16.msra.mxu0 %v4351_v2  ;;  %4360 = vmatpush1.bf16.msra.mxu1 %v4359_v3 }
  0xee   :  { %v905_v20 = vadd.f32 %v4975_v9, %v216_v18  ;;  %v907_v21 = vadd.f32 %v4975_v9, %v329_v19 }
  0xef   :  { %v1000_v24 = vmax.f32 %v904_v16, 0.0  ;;  %v1002_v25 = vmax.f32 %v906_v17, 0.0 }
  0xf0   :  { %v1001_v28 = vmax.f32 %v905_v20, 0.0  ;;  %v1003_v29 = vmax.f32 %v907_v21, 0.0  ;;  %v220_v30 = vpop.f32.mrb[8].mxu0  ;;  %v333_v31 = vpop.f32.mrb[8].mxu1 }
  0xf1   :  { %v4355_v32 = vpack.c.bf16 %v1000_v24, %v976_v22  ;;  %v4363_v33 = vpack.c.bf16 %v1002_v25, %v978_v23  ;;  %v222_v34 = vpop.f32.mrb[9].mxu0  ;;  %v335_v35 = vpop.f32.mrb[9].mxu1  ;;  %v844_v39 = vadd.f32 %v4961_v37, %v220_v30  ;;  %v846_v40 = vadd.f32 %v4961_v37, %v333_v31 }
  0xf2   :  { %v4353_v36 = vpack.c.bf16 %v1001_v28, %v977_v26  ;;  %v4361_v38 = vpack.c.bf16 %v1003_v29, %v979_v27  ;;  %v845_v41 = vadd.f32 %v4961_v37, %v222_v34  ;;  %v847_v43 = vadd.f32 %v4961_v37, %v335_v35 }
  0xf3   :  { %v940_v54 = vmax.f32 %v844_v39, 0.0  ;;  %v942_v55 = vmax.f32 %v846_v40, 0.0 }
  0xf4   :  { %v226_v44 = vpop.f32.mrb[10].mxu0  ;;  %v339_v46 = vpop.f32.mrb[10].mxu1  ;;  %4354 = vmatprep.subr.bf16.mxu0 %v4353_v36  ;;  %4362 = vmatprep.subr.bf16.mxu1 %v4361_v38  ;;  %v941_v58 = vmax.f32 %v845_v41, 0.0  ;;  %v943_v59 = vmax.f32 %v847_v43, 0.0 }
  0xf5   :  { %v868_v47 = vadd.f32 %v4963_v42, %v226_v44  ;;  %v870_v48 = vadd.f32 %v4963_v42, %v339_v46  ;;  %v228_v49 = vpop.f32.mrb[11].mxu0  ;;  %v341_v50 = vpop.f32.mrb[11].mxu1  ;;  %4356 = vmatpush1.bf16.msra.mxu0 %v4355_v32  ;;  %4364 = vmatpush1.bf16.msra.mxu1 %v4363_v33 }
  0xf6   :  { %v869_v52 = vadd.f32 %v4963_v42, %v228_v49  ;;  %v871_v53 = vadd.f32 %v4963_v42, %v341_v50 }
  0xf7   :  { %v964_v56 = vmax.f32 %v868_v47, 0.0  ;;  %v966_v57 = vmax.f32 %v870_v48, 0.0 }
  0xf8   :  { %v965_v60 = vmax.f32 %v869_v52, 0.0  ;;  %v967_v61 = vmax.f32 %v871_v53, 0.0  ;;  %v232_v62 = vpop.f32.mrb[12].mxu0  ;;  %4273 = vmatmul.mubr.msk.f32.vlgmr.msra.gmra.mrb[48].mxu0 %vm1038_vm2, %v4994_v51  ;;  %4275 = vmatmul.mubr.msk.f32.vlgmr.msra.gmra.mrb[48].mxu1 %vm1038_vm2, %v4994_v51  ;;  %v345_v63 = vpop.f32.mrb[12].mxu1 }
  0xf9   :  { %v5002_v0 = vpack.c.bf16 %v964_v56, %v940_v54  ;;  %v5004_v1 = vpack.c.bf16 %v966_v57, %v942_v55  ;;  %v234_v2 = vpop.f32.mrb[13].mxu0  ;;  %v347_v3 = vpop.f32.mrb[13].mxu1  ;;  %1115 = vmatprep.mubr.f32.mxu0 %v4601_v4  ;;  %1192 = vmatprep.mubr.f32.mxu1 %v4601_v4  ;;  %v892_v8 = vadd.f32 %v4967_v45, %v232_v62 }
  0xfa   :  { %v5012_v6 = vpack.c.bf16 %v965_v60, %v941_v58  ;;  %v5014_v7 = vpack.c.bf16 %v967_v61, %v943_v59  ;;  %v894_v10 = vadd.f32 %v4967_v45, %v345_v63  ;;  %v893_v11 = vadd.f32 %v4967_v45, %v234_v2 }
  0xfb   :  { %v895_v12 = vadd.f32 %v4967_v45, %v347_v3  ;;  %v988_v21 = vmax.f32 %v892_v8, 0.0 }
  0xfc   :  { %v238_v13 = vpop.f32.mrb[14].mxu0  ;;  %v351_v14 = vpop.f32.mrb[14].mxu1  ;;  %4274 = vmatmul.mubr.msk.f32.gmra.mrb[50].mxu0 %vm1038_vm2, %v5010_v5  ;;  %4276 = vmatmul.mubr.msk.f32.gmra.mrb[50].mxu1 %vm1038_vm2, %v5010_v5  ;;  %v990_v22 = vmax.f32 %v894_v10, 0.0  ;;  %v989_v25 = vmax.f32 %v893_v11, 0.0 }
  0xfd   :  { %v916_v15 = vadd.f32 %v4975_v9, %v238_v13  ;;  %v918_v16 = vadd.f32 %v4975_v9, %v351_v14  ;;  %v240_v17 = vpop.f32.mrb[15].mxu0  ;;  %v353_v18 = vpop.f32.mrb[15].mxu1  ;;  %1263 = vmatprep.mubr.f32.mxu0 %v4601_v4  ;;  %1340 = vmatprep.mubr.f32.mxu1 %v4601_v4  ;;  %v991_v26 = vmax.f32 %v895_v12, 0.0 }
  0xfe   :  { %v917_v19 = vadd.f32 %v4975_v9, %v240_v17  ;;  %v919_v20 = vadd.f32 %v4975_v9, %v353_v18 }
  0xff   :  { %v1012_v23 = vmax.f32 %v916_v15, 0.0  ;;  %v1014_v24 = vmax.f32 %v918_v16, 0.0 }
 0x100   :  { %v1013_v27 = vmax.f32 %v917_v19, 0.0  ;;  %v1015_v28 = vmax.f32 %v919_v20, 0.0  ;;  %v422_v29 = vpop.f32.mrb[16].mxu0  ;;  %v535_v30 = vpop.f32.mrb[16].mxu1 }
 0x101   :  { %v5031_v31 = vpack.c.bf16 %v1012_v23, %v988_v21  ;;  %v5033_v32 = vpack.c.bf16 %v1014_v24, %v990_v22  ;;  %v424_v33 = vpop.f32.mrb[17].mxu0  ;;  %v537_v34 = vpop.f32.mrb[17].mxu1  ;;  %v836_v38 = vadd.f32 %v4961_v37, %v422_v29  ;;  %v838_v39 = vadd.f32 %v4961_v37, %v535_v30 }
 0x102   :  { %v5035_v35 = vpack.c.bf16 %v1013_v27, %v989_v25  ;;  %v5037_v36 = vpack.c.bf16 %v1015_v28, %v991_v26  ;;  %v837_v40 = vadd.f32 %v4961_v37, %v424_v33  ;;  %v839_v41 = vadd.f32 %v4961_v37, %v537_v34 }
 0x103   :  { %v932_v53 = vmax.f32 %v836_v38, 0.0  ;;  %v934_v54 = vmax.f32 %v838_v39, 0.0 }
 0x104   :  { %v428_v43 = vpop.f32.mrb[18].mxu0  ;;  %v541_v44 = vpop.f32.mrb[18].mxu1  ;;  %v933_v57 = vmax.f32 %v837_v40, 0.0  ;;  %v935_v58 = vmax.f32 %v839_v41, 0.0 }
 0x105   :  { %v860_v46 = vadd.f32 %v4963_v42, %v428_v43  ;;  %v862_v47 = vadd.f32 %v4963_v42, %v541_v44  ;;  %v430_v48 = vpop.f32.mrb[19].mxu0  ;;  %v543_v49 = vpop.f32.mrb[19].mxu1 }
 0x106   :  { %v861_v50 = vadd.f32 %v4963_v42, %v430_v48  ;;  %v863_v52 = vadd.f32 %v4963_v42, %v543_v49 }
 0x107   :  { %v956_v55 = vmax.f32 %v860_v46, 0.0  ;;  %v958_v56 = vmax.f32 %v862_v47, 0.0 }
 0x108   :  { %v957_v59 = vmax.f32 %v861_v50, 0.0  ;;  %v959_v60 = vmax.f32 %v863_v52, 0.0  ;;  %v434_v61 = vpop.f32.mrb[20].mxu0  ;;  %v547_v62 = vpop.f32.mrb[20].mxu1 }
 0x109   :  { %v4367_v63 = vpack.c.bf16 %v956_v55, %v932_v53  ;;  %v4375_v2 = vpack.c.bf16 %v958_v56, %v934_v54  ;;  %v436_v3 = vpop.f32.mrb[21].mxu0  ;;  %v549_v8 = vpop.f32.mrb[21].mxu1  ;;  %v884_v12 = vadd.f32 %v4967_v45, %v434_v61  ;;  %v886_v13 = vadd.f32 %v4967_v45, %v547_v62 }
 0x10a   :  { %v4365_v10 = vpack.c.bf16 %v957_v59, %v933_v57  ;;  %v4373_v11 = vpack.c.bf16 %v959_v60, %v935_v58  ;;  %v885_v14 = vadd.f32 %v4967_v45, %v436_v3  ;;  %v887_v15 = vadd.f32 %v4967_v45, %v549_v8 }
 0x10b   :  { %v980_v24 = vmax.f32 %v884_v12, 0.0  ;;  %v982_v25 = vmax.f32 %v886_v13, 0.0 }
 0x10c   :  { %v440_v16 = vpop.f32.mrb[22].mxu0  ;;  %v553_v17 = vpop.f32.mrb[22].mxu1  ;;  %4366 = vmatprep.subr.bf16.mxu0 %v4365_v10  ;;  %4374 = vmatprep.subr.bf16.mxu1 %v4373_v11  ;;  %v981_v28 = vmax.f32 %v885_v14, 0.0  ;;  %v983_v29 = vmax.f32 %v887_v15, 0.0 }
 0x10d   :  { %v908_v18 = vadd.f32 %v4975_v9, %v440_v16  ;;  %v910_v19 = vadd.f32 %v4975_v9, %v553_v17  ;;  %v442_v20 = vpop.f32.mrb[23].mxu0  ;;  %v555_v21 = vpop.f32.mrb[23].mxu1  ;;  %4368 = vmatpush1.bf16.msra.mxu0 %v4367_v63  ;;  %4376 = vmatpush1.bf16.msra.mxu1 %v4375_v2 }
 0x10e   :  { %v909_v22 = vadd.f32 %v4975_v9, %v442_v20  ;;  %v911_v23 = vadd.f32 %v4975_v9, %v555_v21 }
 0x10f   :  { %v1004_v26 = vmax.f32 %v908_v18, 0.0  ;;  %v1006_v27 = vmax.f32 %v910_v19, 0.0 }
 0x110   :  { %v1005_v30 = vmax.f32 %v909_v22, 0.0  ;;  %v1007_v33 = vmax.f32 %v911_v23, 0.0  ;;  %v446_v34 = vpop.f32.mrb[24].mxu0  ;;  %v559_v38 = vpop.f32.mrb[24].mxu1 }
 0x111   :  { %v4371_v39 = vpack.c.bf16 %v1004_v26, %v980_v24  ;;  %v4379_v40 = vpack.c.bf16 %v1006_v27, %v982_v25  ;;  %v448_v41 = vpop.f32.mrb[25].mxu0  ;;  %v561_v43 = vpop.f32.mrb[25].mxu1  ;;  %v848_v47 = vadd.f32 %v4961_v37, %v446_v34  ;;  %v850_v48 = vadd.f32 %v4961_v37, %v559_v38 }
 0x112   :  { %v4369_v44 = vpack.c.bf16 %v1005_v30, %v981_v28  ;;  %v4377_v46 = vpack.c.bf16 %v1007_v33, %v983_v29  ;;  %v849_v49 = vadd.f32 %v4961_v37, %v448_v41  ;;  %v851_v50 = vadd.f32 %v4961_v37, %v561_v43 }
 0x113   :  { %v944_v60 = vmax.f32 %v848_v47, 0.0  ;;  %v946_v61 = vmax.f32 %v850_v48, 0.0 }
 0x114   :  { %v452_v52 = vpop.f32.mrb[26].mxu0  ;;  %v565_v53 = vpop.f32.mrb[26].mxu1  ;;  %4370 = vmatprep.subr.bf16.mxu0 %v4369_v44  ;;  %4378 = vmatprep.subr.bf16.mxu1 %v4377_v46  ;;  %v945_v2 = vmax.f32 %v849_v49, 0.0  ;;  %v947_v3 = vmax.f32 %v851_v50, 0.0 }
 0x115   :  { %v872_v54 = vadd.f32 %v4963_v42, %v452_v52  ;;  %v874_v55 = vadd.f32 %v4963_v42, %v565_v53  ;;  %v454_v56 = vpop.f32.mrb[27].mxu0  ;;  %v567_v57 = vpop.f32.mrb[27].mxu1  ;;  %4372 = vmatpush1.bf16.msra.mxu0 %v4371_v39  ;;  %4380 = vmatpush1.bf16.msra.mxu1 %v4379_v40 }
 0x116   :  { %v873_v58 = vadd.f32 %v4963_v42, %v454_v56  ;;  %v875_v59 = vadd.f32 %v4963_v42, %v567_v57 }
 0x117   :  { %v968_v62 = vmax.f32 %v872_v54, 0.0  ;;  %v970_v63 = vmax.f32 %v874_v55, 0.0 }
 0x118   :  { %v969_v8 = vmax.f32 %v873_v58, 0.0  ;;  %v971_v10 = vmax.f32 %v875_v59, 0.0  ;;  %v458_v11 = vpop.f32.mrb[28].mxu0  ;;  %v571_v12 = vpop.f32.mrb[28].mxu1  ;;  %4277 = vmatmul.mubr.msk.f32.vlgmr.msra.gmra.mrb[52].mxu0 %vm1038_vm2, %v4994_v51  ;;  %4279 = vmatmul.mubr.msk.f32.vlgmr.msra.gmra.mrb[52].mxu1 %vm1038_vm2, %v4994_v51 }
 0x119   :  { %v5067_v13 = vpack.c.bf16 %v968_v62, %v944_v60  ;;  %v5069_v14 = vpack.c.bf16 %v970_v63, %v946_v61  ;;  %v460_v15 = vpop.f32.mrb[29].mxu0  ;;  %v573_v16 = vpop.f32.mrb[29].mxu1  ;;  %1269 = vmatprep.mubr.f32.mxu0 %v4601_v4  ;;  %1346 = vmatprep.mubr.f32.mxu1 %v4601_v4  ;;  %v896_v19 = vadd.f32 %v4967_v45, %v458_v11 }
 0x11a   :  { %v5072_v17 = vpack.c.bf16 %v969_v8, %v945_v2  ;;  %v5074_v18 = vpack.c.bf16 %v971_v10, %v947_v3  ;;  %v898_v20 = vadd.f32 %v4967_v45, %v571_v12  ;;  %v897_v21 = vadd.f32 %v4967_v45, %v460_v15 }
 0x11b   :  { %v899_v22 = vadd.f32 %v4967_v45, %v573_v16  ;;  %v992_v33 = vmax.f32 %v896_v19, 0.0 }
 0x11c   :  { %v464_v23 = vpop.f32.mrb[30].mxu0  ;;  %v577_v24 = vpop.f32.mrb[30].mxu1  ;;  %4278 = vmatmul.mubr.msk.f32.gmra.mrb[54].mxu0 %vm1038_vm2, %v5010_v5  ;;  %4280 = vmatmul.mubr.msk.f32.gmra.mrb[54].mxu1 %vm1038_vm2, %v5010_v5  ;;  %v994_v34 = vmax.f32 %v898_v20, 0.0  ;;  %v993_v40 = vmax.f32 %v897_v21, 0.0 }
 0x11d   :  { %v920_v25 = vadd.f32 %v4975_v9, %v464_v23  ;;  %v922_v26 = vadd.f32 %v4975_v9, %v577_v24  ;;  %v466_v27 = vpop.f32.mrb[31].mxu0  ;;  %v579_v28 = vpop.f32.mrb[31].mxu1  ;;  %1417 = vmatprep.mubr.f32.mxu0 %v4601_v4  ;;  %1494 = vmatprep.mubr.f32.mxu1 %v4601_v4  ;;  %v995_v41 = vmax.f32 %v899_v22, 0.0 }
 0x11e   :  { %v921_v29 = vadd.f32 %v4975_v9, %v466_v27  ;;  %v923_v30 = vadd.f32 %v4975_v9, %v579_v28 }
 0x11f   :  { %v1016_v38 = vmax.f32 %v920_v25, 0.0  ;;  %v1018_v39 = vmax.f32 %v922_v26, 0.0 }
 0x120   :  { %v1017_v43 = vmax.f32 %v921_v29, 0.0  ;;  %v1019_v44 = vmax.f32 %v923_v30, 0.0  ;;  %v648_v46 = vpop.f32.mrb[32].mxu0  ;;  %v761_v47 = vpop.f32.mrb[32].mxu1 }
 0x121   :  { %v5091_v48 = vpack.c.bf16 %v1016_v38, %v992_v33  ;;  %v5093_v49 = vpack.c.bf16 %v1018_v39, %v994_v34  ;;  %v650_v50 = vpop.f32.mrb[33].mxu0  ;;  %v763_v52 = vpop.f32.mrb[33].mxu1  ;;  %v840_v55 = vadd.f32 %v4961_v37, %v648_v46  ;;  %v842_v56 = vadd.f32 %v4961_v37, %v761_v47 }
 0x122   :  { %v5095_v53 = vpack.c.bf16 %v1017_v43, %v993_v40  ;;  %v5097_v54 = vpack.c.bf16 %v1019_v44, %v995_v41  ;;  %v841_v57 = vadd.f32 %v4961_v37, %v650_v50  ;;  %v843_v58 = vadd.f32 %v4961_v37, %v763_v52 }
 0x123   :  { %v936_v10 = vmax.f32 %v840_v55, 0.0  ;;  %v938_v11 = vmax.f32 %v842_v56, 0.0 }
 0x124   :  { %v654_v59 = vpop.f32.mrb[34].mxu0  ;;  %v767_v60 = vpop.f32.mrb[34].mxu1  ;;  %v937_v16 = vmax.f32 %v841_v57, 0.0  ;;  %v939_v19 = vmax.f32 %v843_v58, 0.0 }
 0x125   :  { %v864_v61 = vadd.f32 %v4963_v42, %v654_v59  ;;  %v866_v62 = vadd.f32 %v4963_v42, %v767_v60  ;;  %v656_v63 = vpop.f32.mrb[35].mxu0  ;;  %v769_v2 = vpop.f32.mrb[35].mxu1 }
 0x126   :  { %v865_v3 = vadd.f32 %v4963_v42, %v656_v63  ;;  %v867_v8 = vadd.f32 %v4963_v42, %v769_v2 }
 0x127   :  { %v960_v12 = vmax.f32 %v864_v61, 0.0  ;;  %v962_v15 = vmax.f32 %v866_v62, 0.0 }
 0x128   :  { %v961_v20 = vmax.f32 %v865_v3, 0.0  ;;  %v963_v21 = vmax.f32 %v867_v8, 0.0  ;;  %v660_v22 = vpop.f32.mrb[36].mxu0  ;;  %v773_v23 = vpop.f32.mrb[36].mxu1 }
 0x129   :  { %v4383_v24 = vpack.c.bf16 %v960_v12, %v936_v10  ;;  %v4391_v25 = vpack.c.bf16 %v962_v15, %v938_v11  ;;  %v662_v26 = vpop.f32.mrb[37].mxu0  ;;  %v775_v27 = vpop.f32.mrb[37].mxu1  ;;  %v888_v30 = vadd.f32 %v4967_v45, %v660_v22  ;;  %v890_v33 = vadd.f32 %v4967_v45, %v773_v23 }
 0x12a   :  { %v4381_v28 = vpack.c.bf16 %v961_v20, %v937_v16  ;;  %v4389_v29 = vpack.c.bf16 %v963_v21, %v939_v19  ;;  %v889_v34 = vadd.f32 %v4967_v45, %v662_v26  ;;  %v891_v38 = vadd.f32 %v4967_v45, %v775_v27 }
 0x12b   :  { %v984_v52 = vmax.f32 %v888_v30, 0.0  ;;  %v986_v55 = vmax.f32 %v890_v33, 0.0 }
 0x12c   :  { %v666_v39 = vpop.f32.mrb[38].mxu0  ;;  %v779_v40 = vpop.f32.mrb[38].mxu1  ;;  %4382 = vmatprep.subr.bf16.mxu0 %v4381_v28  ;;  %4390 = vmatprep.subr.bf16.mxu1 %v4389_v29  ;;  %v985_v58 = vmax.f32 %v889_v34, 0.0  ;;  %v987_v59 = vmax.f32 %v891_v38, 0.0 }
 0x12d   :  { %v912_v41 = vadd.f32 %v4975_v9, %v666_v39  ;;  %v914_v43 = vadd.f32 %v4975_v9, %v779_v40  ;;  %v668_v44 = vpop.f32.mrb[39].mxu0  ;;  %v781_v46 = vpop.f32.mrb[39].mxu1  ;;  %4384 = vmatpush1.bf16.msra.mxu0 %v4383_v24  ;;  %4392 = vmatpush1.bf16.msra.mxu1 %v4391_v25 }
 0x12e   :  { %v913_v47 = vadd.f32 %v4975_v9, %v668_v44  ;;  %v915_v50 = vadd.f32 %v4975_v9, %v781_v46 }
 0x12f   :  { %v1008_v56 = vmax.f32 %v912_v41, 0.0  ;;  %v1010_v57 = vmax.f32 %v914_v43, 0.0 }
 0x130   :  { %v1009_v60 = vmax.f32 %v913_v47, 0.0  ;;  %v1011_v61 = vmax.f32 %v915_v50, 0.0  ;;  %v672_v62 = vpop.f32.mrb[40].mxu0  ;;  %v785_v63 = vpop.f32.mrb[40].mxu1 }
 0x131   :  { %v4387_v2 = vpack.c.bf16 %v1008_v56, %v984_v52  ;;  %v4395_v3 = vpack.c.bf16 %v1010_v57, %v986_v55  ;;  %v674_v8 = vpop.f32.mrb[41].mxu0  ;;  %v787_v10 = vpop.f32.mrb[41].mxu1  ;;  %v852_v15 = vadd.f32 %v4961_v37, %v672_v62  ;;  %v854_v16 = vadd.f32 %v4961_v37, %v785_v63 }
 0x132   :  { %v4385_v11 = vpack.c.bf16 %v1009_v60, %v985_v58  ;;  %v4393_v12 = vpack.c.bf16 %v1011_v61, %v987_v59  ;;  %v853_v19 = vadd.f32 %v4961_v37, %v674_v8  ;;  %v855_v20 = vadd.f32 %v4961_v37, %v787_v10 }
 0x133   :  { %v948_v37 = vmax.f32 %v852_v15, 0.0  ;;  %v950_v29 = vmax.f32 %v854_v16, 0.0 }
 0x134   :  { %v678_v21 = vpop.f32.mrb[42].mxu0  ;;  %v791_v22 = vpop.f32.mrb[42].mxu1  ;;  %4386 = vmatprep.subr.bf16.mxu0 %v4385_v11  ;;  %4394 = vmatprep.subr.bf16.mxu1 %v4393_v12  ;;  %v949_v34 = vmax.f32 %v853_v19, 0.0  ;;  %v951_v38 = vmax.f32 %v855_v20, 0.0 }
 0x135   :  { %v876_v23 = vadd.f32 %v4963_v42, %v678_v21  ;;  %v878_v24 = vadd.f32 %v4963_v42, %v791_v22  ;;  %v680_v25 = vpop.f32.mrb[43].mxu0  ;;  %v793_v26 = vpop.f32.mrb[43].mxu1  ;;  %4388 = vmatpush1.bf16.msra.mxu0 %v4387_v2  ;;  %4396 = vmatpush1.bf16.msra.mxu1 %v4395_v3 }
 0x136   :  { %v877_v27 = vadd.f32 %v4963_v42, %v680_v25  ;;  %v879_v28 = vadd.f32 %v4963_v42, %v793_v26  ;;  %4398 = vmatprep.subr.bf16.mxu0 %v5012_v6  ;;  %4406 = vmatprep.subr.bf16.mxu1 %v5014_v7 }
 0x137   :  { %v972_v30 = vmax.f32 %v876_v23, 0.0  ;;  %v974_v33 = vmax.f32 %v878_v24, 0.0 }
 0x138   :  { %v973_v39 = vmax.f32 %v877_v27, 0.0  ;;  %v975_v40 = vmax.f32 %v879_v28, 0.0  ;;  %v684_v41 = vpop.f32.mrb[44].mxu0  ;;  %v797_v43 = vpop.f32.mrb[44].mxu1  ;;  %4281 = vmatmul.mubr.msk.f32.vlgmr.msra.gmra.mrb[56].mxu0 %vm1038_vm2, %v4994_v51  ;;  %4283 = vmatmul.mubr.msk.f32.vlgmr.msra.gmra.mrb[56].mxu1 %vm1038_vm2, %v4994_v51 }
 0x139   :  { %v4431_v42 = vpack.c.bf16 %v972_v30, %v948_v37  ;;  %v4439_v6 = vpack.c.bf16 %v974_v33, %v950_v29  ;;  %v686_v44 = vpop.f32.mrb[45].mxu0  ;;  %v799_v7 = vpop.f32.mrb[45].mxu1  ;;  %4400 = vmatpush1.bf16.msra.mxu0 %v5002_v0  ;;  %4408 = vmatpush1.bf16.msra.mxu1 %v5004_v1  ;;  %v900_v50 = vadd.f32 %v4967_v45, %v684_v41 }
 0x13a   :  { %v4429_v46 = vpack.c.bf16 %v973_v39, %v949_v34  ;;  %v4437_v47 = vpack.c.bf16 %v975_v40, %v951_v38  ;;  %v902_v52 = vadd.f32 %v4967_v45, %v797_v43  ;;  %4402 = vmatprep.subr.bf16.mxu0 %v5035_v35  ;;  %4410 = vmatprep.subr.bf16.mxu1 %v5037_v36  ;;  %v5210_v40 = vld [vmem:[%s5531_s6] sm:$0x1f] }
 0x13b   :  { %v901_v55 = vadd.f32 %v4967_v45, %v686_v44  ;;  %v903_v56 = vadd.f32 %v4967_v45, %v799_v7  ;;  %1423 = vmatprep.mubr.f32.mxu0 %v4601_v4  ;;  %1500 = vmatprep.mubr.f32.mxu1 %v4601_v4  ;;  %v996_v60 = vmax.f32 %v900_v50, 0.0 }
 0x13c   :  { %v690_v0 = vpop.f32.mrb[46].mxu0  ;;  %v803_v57 = vpop.f32.mrb[46].mxu1  ;;  %4282 = vmatmul.mubr.msk.f32.gmra.mrb[58].mxu0 %vm1038_vm2, %v5010_v5  ;;  %4284 = vmatmul.mubr.msk.f32.gmra.mrb[58].mxu1 %vm1038_vm2, %v5010_v5  ;;  %v998_v61 = vmax.f32 %v902_v52, 0.0 }
 0x13d   :  { %v924_v1 = vadd.f32 %v4975_v9, %v690_v0  ;;  %v926_v58 = vadd.f32 %v4975_v9, %v803_v57  ;;  %v692_v35 = vpop.f32.mrb[47].mxu0  ;;  %v805_v36 = vpop.f32.mrb[47].mxu1  ;;  %4404 = vmatpush1.bf16.msra.mxu0 %v5031_v31  ;;  %4412 = vmatpush1.bf16.msra.mxu1 %v5033_v32  ;;  %v997_v2 = vmax.f32 %v901_v55, 0.0  ;;  %v999_v3 = vmax.f32 %v903_v56, 0.0 }
 0x13e   :  { %v925_v45 = vadd.f32 %v4975_v9, %v692_v35  ;;  %v927_v59 = vadd.f32 %v4975_v9, %v805_v36  ;;  %4414 = vmatprep.subr.bf16.mxu0 %v5072_v17  ;;  %4422 = vmatprep.subr.bf16.mxu1 %v5074_v18 }
 0x13f   :  { %v1020_v62 = vmax.f32 %v924_v1, 0.0  ;;  %v1022_v63 = vmax.f32 %v926_v58, 0.0  ;;  %1571 = vmatprep.mubr.f32.mxu0 %v4601_v4  ;;  %1648 = vmatprep.mubr.f32.mxu1 %v4601_v4 }
 0x140   :  { %v1021_v8 = vmax.f32 %v925_v45, 0.0  ;;  %v1023_v10 = vmax.f32 %v927_v59, 0.0  ;;  %4285 = vmatmul.mubr.msk.f32.vlgmr.msra.gmra.mrb[60].mxu0 %vm1038_vm2, %v4994_v51  ;;  %4287 = vmatmul.mubr.msk.f32.vlgmr.msra.gmra.mrb[60].mxu1 %vm1038_vm2, %v4994_v51 }
 0x141   :  { %v4435_v9 = vpack.c.bf16 %v1020_v62, %v996_v60  ;;  %v4443_v31 = vpack.c.bf16 %v1022_v63, %v998_v61  ;;  %4416 = vmatpush1.bf16.msra.mxu0 %v5067_v13  ;;  %4424 = vmatpush1.bf16.msra.mxu1 %v5069_v14 }
 0x142   :  { %v4433_v32 = vpack.c.bf16 %v1021_v8, %v997_v2  ;;  %v4441_v17 = vpack.c.bf16 %v1023_v10, %v999_v3  ;;  %4418 = vmatprep.subr.bf16.mxu0 %v5095_v53  ;;  %4426 = vmatprep.subr.bf16.mxu1 %v5097_v54 }
 0x143   :  { %1577 = vmatprep.mubr.f32.mxu0 %v4601_v4  ;;  %1654 = vmatprep.mubr.f32.mxu1 %v4601_v4 }
 0x144   :  { %4286 = vmatmul.mubr.msk.f32.gmra.mrb[62].mxu0 %vm1038_vm2, %v5010_v5  ;;  %4288 = vmatmul.mubr.msk.f32.gmra.mrb[62].mxu1 %vm1038_vm2, %v5010_v5 }
 0x145   :  { %4420 = vmatpush1.bf16.msra.mxu0 %v5091_v48  ;;  %4428 = vmatpush1.bf16.msra.mxu1 %v5093_v49  ;;  %v5195_v49 = vpop.permute.xlu0 %1030 }
 0x146   :  { %4430 = vmatprep.subr.bf16.mxu0 %v4429_v46  ;;  %4438 = vmatprep.subr.bf16.mxu1 %v4437_v47 }
 0x147   :  { %1725 = vmatprep.mubr.f32.mxu0 %v4601_v4  ;;  %1802 = vmatprep.mubr.f32.mxu1 %v4601_v4 }
 0x148   :  { %4289 = vmatmul.mubr.msk.f32.vlgmr.msra.gmra.mrb[64].mxu0 %vm1038_vm2, %v4994_v51  ;;  %4291 = vmatmul.mubr.msk.f32.vlgmr.msra.gmra.mrb[64].mxu1 %vm1038_vm2, %v4994_v51 }
 0x149   :  { %4432 = vmatpush1.bf16.msra.mxu0 %v4431_v42  ;;  %4440 = vmatpush1.bf16.msra.mxu1 %v4439_v6 }
 0x14a   :  { %4434 = vmatprep.subr.bf16.mxu0 %v4433_v32  ;;  %4442 = vmatprep.subr.bf16.mxu1 %v4441_v17 }
 0x14b   :  { %1731 = vmatprep.mubr.f32.mxu0 %v4601_v4  ;;  %1808 = vmatprep.mubr.f32.mxu1 %v4601_v4 }
 0x14c   :  { %4290 = vmatmul.mubr.msk.f32.gmra.mrb[66].mxu0 %vm1038_vm2, %v5010_v5  ;;  %4292 = vmatmul.mubr.msk.f32.gmra.mrb[66].mxu1 %vm1038_vm2, %v5010_v5 }
 0x14d   :  { %4436 = vmatpush1.bf16.msra.mxu0 %v4435_v9  ;;  %4444 = vmatpush1.bf16.msra.mxu1 %v4443_v31 }
 0x14e   :  { %1879 = vmatprep.mubr.f32.mxu0 %v4601_v4  ;;  %1956 = vmatprep.mubr.f32.mxu1 %v4601_v4 }
 0x150   :  { %4293 = vmatmul.mubr.msk.f32.vlgmr.msra.gmra.mrb[68].mxu0 %vm1038_vm2, %v4994_v51  ;;  %4295 = vmatmul.mubr.msk.f32.vlgmr.msra.gmra.mrb[68].mxu1 %vm1038_vm2, %v4994_v51  ;;  %v5197_v51 = vpop.permute.xlu1 %1035 }
 0x151   :  { %1885 = vmatprep.mubr.f32.mxu0 %v4601_v4  ;;  %1962 = vmatprep.mubr.f32.mxu1 %v4601_v4 }
 0x154   :  { %4294 = vmatmul.mubr.msk.f32.gmra.mrb[70].mxu0 %vm1038_vm2, %v5010_v5  ;;  %4296 = vmatmul.mubr.msk.f32.gmra.mrb[70].mxu1 %vm1038_vm2, %v5010_v5 }
 0x155   :  { %2092 = vmatprep.mubr.f32.mxu0 %v4601_v4  ;;  %2163 = vmatprep.mubr.f32.mxu1 %v4601_v4 }
 0x1cb   :  { %v1111_v13 = vpop.f32.mrb[48].mxu0  ;;  %v1188_v14 = vpop.f32.mrb[48].mxu1 }
 0x1cc   :  { %v1113_v18 = vpop.f32.mrb[49].mxu0  ;;  %v1190_v48 = vpop.f32.mrb[49].mxu1  ;;  %v1112_v53 = vadd.f32 %v1111_v13, %v5195_v49  ;;  %v1189_v54 = vadd.f32 %v1188_v14, %v5195_v49 }
 0x1cd   :  { %v1114_v11 = vadd.f32 %v1113_v18, %v5195_v49  ;;  %v1191_v5 = vadd.f32 %v1190_v48, %v5195_v49 }
 0x1ce   :  { %v1969_v24 = vmax.f32 %v1112_v53, 0.0  ;;  %v1971_v25 = vmax.f32 %v1189_v54, 0.0 }
 0x1cf   :  { %v1117_v12 = vpop.f32.mrb[50].mxu0  ;;  %v1194_v15 = vpop.f32.mrb[50].mxu1  ;;  %v1970_v28 = vmax.f32 %v1114_v11, 0.0  ;;  %v1972_v37 = vmax.f32 %v1191_v5, 0.0 }
 0x1d0   :  { %v1118_v16 = vadd.f32 %v1117_v12, %v5197_v51  ;;  %v1195_v19 = vadd.f32 %v1194_v15, %v5197_v51  ;;  %v1119_v20 = vpop.f32.mrb[51].mxu0  ;;  %v1196_v21 = vpop.f32.mrb[51].mxu1 }
 0x1d1   :  { %v1120_v22 = vadd.f32 %v1119_v20, %v5197_v51  ;;  %v1197_v23 = vadd.f32 %v1196_v21, %v5197_v51 }
 0x1d2   :  { %v1993_v26 = vmax.f32 %v1118_v16, 0.0  ;;  %v1995_v27 = vmax.f32 %v1195_v19, 0.0 }
 0x1d3   :  { %v1994_v29 = vmax.f32 %v1120_v22, 0.0  ;;  %v1996_v30 = vmax.f32 %v1197_v23, 0.0 }
 0x1d4   :  { %v4447_v33 = vpack.c.bf16 %v1993_v26, %v1969_v24  ;;  %v4451_v34 = vpack.c.bf16 %v1995_v27, %v1971_v25 }
 0x1d5   :  { %v4445_v38 = vpack.c.bf16 %v1994_v29, %v1970_v28  ;;  %v4449_v39 = vpack.c.bf16 %v1996_v30, %v1972_v37 }
 0x1d7   :  { %4446 = vmatprep.subr.bf16.mxu0 %v4445_v38  ;;  %4450 = vmatprep.subr.bf16.mxu1 %v4449_v39 }
 0x1d8   :  { %4448 = vmatpush1.bf16.msra.mxu0 %v4447_v33  ;;  %4452 = vmatpush1.bf16.msra.mxu1 %v4451_v34 }
 0x1db   :  { %4297 = vmatmul.mubr.msk.f32.vlgmr.msra.gmra.mrb[72].mxu0 %vm2024_vm3, %v5210_v40  ;;  %4298 = vmatmul.mubr.msk.f32.vlgmr.msra.gmra.mrb[72].mxu1 %vm2024_vm3, %v5210_v40 }
 0x1dc   :  { %2234 = vmatprep.mubr.f32.mxu0 %v4601_v4  ;;  %2305 = vmatprep.mubr.f32.mxu1 %v4601_v4 }
 0x1eb   :  { %v1265_v41 = vpop.f32.mrb[52].mxu0  ;;  %v1342_v43 = vpop.f32.mrb[52].mxu1 }
 0x1ec   :  { %v1267_v42 = vpop.f32.mrb[53].mxu0  ;;  %v1344_v6 = vpop.f32.mrb[53].mxu1  ;;  %v1266_v44 = vadd.f32 %v1265_v41, %v5195_v49  ;;  %v1343_v7 = vadd.f32 %v1342_v43, %v5195_v49 }
 0x1ed   :  { %v1268_v46 = vadd.f32 %v1267_v42, %v5195_v49  ;;  %v1345_v47 = vadd.f32 %v1344_v6, %v5195_v49 }
 0x1ee   :  { %v1973_v35 = vmax.f32 %v1266_v44, 0.0  ;;  %v1975_v36 = vmax.f32 %v1343_v7, 0.0 }
 0x1ef   :  { %v1271_v50 = vpop.f32.mrb[54].mxu0  ;;  %v1348_v52 = vpop.f32.mrb[54].mxu1  ;;  %v1974_v60 = vmax.f32 %v1268_v46, 0.0  ;;  %v1976_v61 = vmax.f32 %v1345_v47, 0.0 }
 0x1f0   :  { %v1272_v55 = vadd.f32 %v1271_v50, %v5197_v51  ;;  %v1349_v56 = vadd.f32 %v1348_v52, %v5197_v51  ;;  %v1273_v0 = vpop.f32.mrb[55].mxu0  ;;  %v1350_v57 = vpop.f32.mrb[55].mxu1 }
 0x1f1   :  { %v1274_v1 = vadd.f32 %v1273_v0, %v5197_v51  ;;  %v1351_v58 = vadd.f32 %v1350_v57, %v5197_v51 }
 0x1f2   :  { %v1997_v45 = vmax.f32 %v1272_v55, 0.0  ;;  %v1999_v59 = vmax.f32 %v1349_v56, 0.0 }
 0x1f3   :  { %v1998_v62 = vmax.f32 %v1274_v1, 0.0  ;;  %v2000_v63 = vmax.f32 %v1351_v58, 0.0 }
 0x1f4   :  { %v4455_v2 = vpack.c.bf16 %v1997_v45, %v1973_v35  ;;  %v4459_v3 = vpack.c.bf16 %v1999_v59, %v1975_v36 }
 0x1f5   :  { %v4453_v8 = vpack.c.bf16 %v1998_v62, %v1974_v60  ;;  %v4457_v10 = vpack.c.bf16 %v2000_v63, %v1976_v61 }
 0x1f7   :  { %4454 = vmatprep.subr.bf16.mxu0 %v4453_v8  ;;  %4458 = vmatprep.subr.bf16.mxu1 %v4457_v10 }
 0x1f8   :  { %4456 = vmatpush1.bf16.msra.mxu0 %v4455_v2  ;;  %4460 = vmatpush1.bf16.msra.mxu1 %v4459_v3 }
 0x1fb   :  { %4299 = vmatmul.mubr.msk.f32.vlgmr.msra.gmra.mrb[74].mxu0 %vm2024_vm3, %v5210_v40  ;;  %4300 = vmatmul.mubr.msk.f32.vlgmr.msra.gmra.mrb[74].mxu1 %vm2024_vm3, %v5210_v40 }
 0x1fc   :  { %2376 = vmatprep.mubr.f32.mxu0 %v4601_v4  ;;  %2447 = vmatprep.mubr.f32.mxu1 %v4601_v4 }
 0x20b   :  { %v1419_v9 = vpop.f32.mrb[56].mxu0  ;;  %v1496_v31 = vpop.f32.mrb[56].mxu1 }
 0x20c   :  { %v1421_v32 = vpop.f32.mrb[57].mxu0  ;;  %v1498_v17 = vpop.f32.mrb[57].mxu1  ;;  %v1420_v13 = vadd.f32 %v1419_v9, %v5195_v49  ;;  %v1497_v14 = vadd.f32 %v1496_v31, %v5195_v49 }
 0x20d   :  { %v1422_v18 = vadd.f32 %v1421_v32, %v5195_v49  ;;  %v1499_v48 = vadd.f32 %v1498_v17, %v5195_v49 }
 0x20e   :  { %v1977_v20 = vmax.f32 %v1420_v13, 0.0  ;;  %v1979_v21 = vmax.f32 %v1497_v14, 0.0 }
 0x20f   :  { %v1425_v53 = vpop.f32.mrb[58].mxu0  ;;  %v1502_v54 = vpop.f32.mrb[58].mxu1  ;;  %v1978_v24 = vmax.f32 %v1422_v18, 0.0  ;;  %v1980_v25 = vmax.f32 %v1499_v48, 0.0 }
 0x210   :  { %v1426_v11 = vadd.f32 %v1425_v53, %v5197_v51  ;;  %v1503_v5 = vadd.f32 %v1502_v54, %v5197_v51  ;;  %v1427_v12 = vpop.f32.mrb[59].mxu0  ;;  %v1504_v15 = vpop.f32.mrb[59].mxu1 }
 0x211   :  { %v1428_v16 = vadd.f32 %v1427_v12, %v5197_v51  ;;  %v1505_v19 = vadd.f32 %v1504_v15, %v5197_v51 }
 0x212   :  { %v2001_v22 = vmax.f32 %v1426_v11, 0.0  ;;  %v2003_v23 = vmax.f32 %v1503_v5, 0.0 }
 0x213   :  { %v2002_v26 = vmax.f32 %v1428_v16, 0.0  ;;  %v2004_v27 = vmax.f32 %v1505_v19, 0.0  ;;  %v1573_v28 = vpop.f32.mrb[60].mxu0  ;;  %v1650_v37 = vpop.f32.mrb[60].mxu1 }
 0x214   :  { %v4463_v29 = vpack.c.bf16 %v2001_v22, %v1977_v20  ;;  %v4467_v30 = vpack.c.bf16 %v2003_v23, %v1979_v21  ;;  %v1575_v33 = vpop.f32.mrb[61].mxu0  ;;  %v1652_v34 = vpop.f32.mrb[61].mxu1  ;;  %v1574_v41 = vadd.f32 %v1573_v28, %v5195_v49  ;;  %v1651_v43 = vadd.f32 %v1650_v37, %v5195_v49 }
 0x215   :  { %v4461_v38 = vpack.c.bf16 %v2002_v26, %v1978_v24  ;;  %v4465_v39 = vpack.c.bf16 %v2004_v27, %v1980_v25  ;;  %v1576_v42 = vadd.f32 %v1575_v33, %v5195_v49  ;;  %v1653_v6 = vadd.f32 %v1652_v34, %v5195_v49 }
 0x216   :  { %v1981_v0 = vmax.f32 %v1574_v41, 0.0  ;;  %v1983_v57 = vmax.f32 %v1651_v43, 0.0 }
 0x217   :  { %v1579_v44 = vpop.f32.mrb[62].mxu0  ;;  %v1656_v7 = vpop.f32.mrb[62].mxu1  ;;  %4462 = vmatprep.subr.bf16.mxu0 %v4461_v38  ;;  %4466 = vmatprep.subr.bf16.mxu1 %v4465_v39  ;;  %v1982_v35 = vmax.f32 %v1576_v42, 0.0  ;;  %v1984_v36 = vmax.f32 %v1653_v6, 0.0 }
 0x218   :  { %v1580_v46 = vadd.f32 %v1579_v44, %v5197_v51  ;;  %v1657_v47 = vadd.f32 %v1656_v7, %v5197_v51  ;;  %v1581_v50 = vpop.f32.mrb[63].mxu0  ;;  %v1658_v52 = vpop.f32.mrb[63].mxu1  ;;  %4464 = vmatpush1.bf16.msra.mxu0 %v4463_v29  ;;  %4468 = vmatpush1.bf16.msra.mxu1 %v4467_v30 }
 0x219   :  { %v1582_v55 = vadd.f32 %v1581_v50, %v5197_v51  ;;  %v1659_v56 = vadd.f32 %v1658_v52, %v5197_v51 }
 0x21a   :  { %v2005_v1 = vmax.f32 %v1580_v46, 0.0  ;;  %v2007_v58 = vmax.f32 %v1657_v47, 0.0 }
 0x21b   :  { %v2006_v45 = vmax.f32 %v1582_v55, 0.0  ;;  %v2008_v59 = vmax.f32 %v1659_v56, 0.0  ;;  %v1727_v60 = vpop.f32.mrb[64].mxu0  ;;  %v1804_v61 = vpop.f32.mrb[64].mxu1  ;;  %4301 = vmatmul.mubr.msk.f32.vlgmr.msra.gmra.mrb[76].mxu0 %vm2024_vm3, %v5210_v40  ;;  %4302 = vmatmul.mubr.msk.f32.vlgmr.msra.gmra.mrb[76].mxu1 %vm2024_vm3, %v5210_v40 }
 0x21c   :  { %v4471_v62 = vpack.c.bf16 %v2005_v1, %v1981_v0  ;;  %v4475_v63 = vpack.c.bf16 %v2007_v58, %v1983_v57  ;;  %v1729_v2 = vpop.f32.mrb[65].mxu0  ;;  %v1806_v3 = vpop.f32.mrb[65].mxu1  ;;  %2518 = vmatprep.mubr.f32.mxu0 %v4601_v4  ;;  %2589 = vmatprep.mubr.f32.mxu1 %v4601_v4  ;;  %v1728_v9 = vadd.f32 %v1727_v60, %v5195_v49  ;;  %v2906_v60 = vld [vmem:[%s5526_s1 + $0x10] sm:$0x3f] }
 0x21d   :  { %v4469_v8 = vpack.c.bf16 %v2006_v45, %v1982_v35  ;;  %v4473_v10 = vpack.c.bf16 %v2008_v59, %v1984_v36  ;;  %v1805_v31 = vadd.f32 %v1804_v61, %v5195_v49  ;;  %v1730_v32 = vadd.f32 %v1729_v2, %v5195_v49  ;;  %v2904_v45 = vld [vmem:[%s5526_s1] sm:$0x3f]  ;;  %v2905_v59 = vld [vmem:[%s5526_s1 + $0x8] sm:$0x3f]  ;;  %2914 = vst [vmem:[#allocation2 + $0x10] sm:$0x3f] %v2906_v60 }
 0x21e   :  { %v1807_v17 = vadd.f32 %v1806_v3, %v5195_v49  ;;  %v1985_v12 = vmax.f32 %v1728_v9, 0.0  ;;  %2912 = vst [vmem:[#allocation2] sm:$0x3f] %v2904_v45  ;;  %2913 = vst [vmem:[#allocation2 + $0x8] sm:$0x3f] %v2905_v59  ;;  %v5312_v3 = vpop.permute.xlu0 %2021 }
 0x21f   :  { %v1733_v13 = vpop.f32.mrb[66].mxu0  ;;  %v1810_v14 = vpop.f32.mrb[66].mxu1  ;;  %4470 = vmatprep.subr.bf16.mxu0 %v4469_v8  ;;  %4474 = vmatprep.subr.bf16.mxu1 %v4473_v10  ;;  %v1987_v15 = vmax.f32 %v1805_v31, 0.0  ;;  %v1986_v20 = vmax.f32 %v1730_v32, 0.0  ;;  %v2908_v61 = vld [vmem:[%s5526_s1 + $0x20] sm:$0x3f] }
 0x220   :  { %v1734_v18 = vadd.f32 %v1733_v13, %v5197_v51  ;;  %v1811_v48 = vadd.f32 %v1810_v14, %v5197_v51  ;;  %v1735_v53 = vpop.f32.mrb[67].mxu0  ;;  %v1812_v54 = vpop.f32.mrb[67].mxu1  ;;  %4472 = vmatpush1.bf16.msra.mxu0 %v4471_v62  ;;  %4476 = vmatpush1.bf16.msra.mxu1 %v4475_v63  ;;  %v1988_v21 = vmax.f32 %v1807_v17, 0.0  ;;  %v2909_v62 = vld [vmem:[%s5526_s1 + $0x28] sm:$0x3f] }
 0x221   :  { %v1736_v11 = vadd.f32 %v1735_v53, %v5197_v51  ;;  %v1813_v5 = vadd.f32 %v1812_v54, %v5197_v51  ;;  %2916 = vst [vmem:[#allocation2 + $0x20] sm:$0x3f] %v2908_v61  ;;  %2917 = vst [vmem:[#allocation2 + $0x28] sm:$0x3f] %v2909_v62  ;;  %v2910_v63 = vld [vmem:[%s5526_s1 + $0x30] sm:$0x3f] }
 0x222   :  { %v2009_v16 = vmax.f32 %v1734_v18, 0.0  ;;  %v2011_v19 = vmax.f32 %v1811_v48, 0.0  ;;  %v2911_v2 = vld [vmem:[%s5526_s1 + $0x38] sm:$0x3f]  ;;  %2918 = vst [vmem:[#allocation2 + $0x30] sm:$0x3f] %v2910_v63 }
 0x223   :  { %v2010_v22 = vmax.f32 %v1736_v11, 0.0  ;;  %v2012_v23 = vmax.f32 %v1813_v5, 0.0  ;;  %v1881_v24 = vpop.f32.mrb[68].mxu0  ;;  %v1958_v25 = vpop.f32.mrb[68].mxu1  ;;  %4303 = vmatmul.mubr.msk.f32.vlgmr.msra.gmra.mrb[78].mxu0 %vm2024_vm3, %v5210_v40  ;;  %4304 = vmatmul.mubr.msk.f32.vlgmr.msra.gmra.mrb[78].mxu1 %vm2024_vm3, %v5210_v40  ;;  %2919 = vst [vmem:[#allocation2 + $0x38] sm:$0x3f] %v2911_v2 }
 0x224   :  { %v4479_v26 = vpack.c.bf16 %v2009_v16, %v1985_v12  ;;  %v4483_v27 = vpack.c.bf16 %v2011_v19, %v1987_v15  ;;  %v1883_v28 = vpop.f32.mrb[69].mxu0  ;;  %v1960_v37 = vpop.f32.mrb[69].mxu1  ;;  %2660 = vmatprep.mubr.f32.mxu0 %v4601_v4  ;;  %2731 = vmatprep.mubr.f32.mxu1 %v4601_v4  ;;  %v1882_v33 = vadd.f32 %v1881_v24, %v5195_v49 }
 0x225   :  { %v4477_v29 = vpack.c.bf16 %v2010_v22, %v1986_v20  ;;  %v4481_v30 = vpack.c.bf16 %v2012_v23, %v1988_v21  ;;  %v1959_v34 = vadd.f32 %v1958_v25, %v5195_v49  ;;  %v1884_v38 = vadd.f32 %v1883_v28, %v5195_v49 }
 0x226   :  { %v1961_v39 = vadd.f32 %v1960_v37, %v5195_v49  ;;  %v1989_v50 = vmax.f32 %v1882_v33, 0.0 }
 0x227   :  { %v1887_v41 = vpop.f32.mrb[70].mxu0  ;;  %v1964_v43 = vpop.f32.mrb[70].mxu1  ;;  %4478 = vmatprep.subr.bf16.mxu0 %v4477_v29  ;;  %4482 = vmatprep.subr.bf16.mxu1 %v4481_v30  ;;  %v1991_v52 = vmax.f32 %v1959_v34, 0.0  ;;  %v1990_v56 = vmax.f32 %v1884_v38, 0.0 }
 0x228   :  { %v1888_v42 = vadd.f32 %v1887_v41, %v5197_v51  ;;  %v1965_v6 = vadd.f32 %v1964_v43, %v5197_v51  ;;  %v1889_v44 = vpop.f32.mrb[71].mxu0  ;;  %v1966_v7 = vpop.f32.mrb[71].mxu1  ;;  %4480 = vmatpush1.bf16.msra.mxu0 %v4479_v26  ;;  %4484 = vmatpush1.bf16.msra.mxu1 %v4483_v27  ;;  %v1992_v0 = vmax.f32 %v1961_v39, 0.0  ;;  %v5331_v39 = vld [vmem:[%s5533_s8] sm:$0xff]  ;;  %v5339_v41 = vld [vmem:[%s5533_s8 + $0x8] sm:$0xff]  ;;  %v5347_v43 = vld [vmem:[%s5533_s8 + $0x10] sm:$0xff] }
 0x229   :  { %v1890_v46 = vadd.f32 %v1889_v44, %v5197_v51  ;;  %v1967_v47 = vadd.f32 %v1966_v7, %v5197_v51 }
 0x22a   :  { %v2013_v55 = vmax.f32 %v1888_v42, 0.0  ;;  %v2015_v49 = vmax.f32 %v1965_v6, 0.0 }
 0x22b   :  { %v2014_v57 = vmax.f32 %v1890_v46, 0.0  ;;  %v2016_v1 = vmax.f32 %v1967_v47, 0.0  ;;  %4305 = vmatmul.mubr.msk.f32.vlgmr.msra.gmra.mrb[80].mxu0 %vm2024_vm3, %v5210_v40  ;;  %4306 = vmatmul.mubr.msk.f32.vlgmr.msra.gmra.mrb[80].mxu1 %vm2024_vm3, %v5210_v40  ;;  %v5357_v46 = vld [vmem:[%s5533_s8 + $0x18] sm:$0xff] }
 0x22c   :  { %v4487_v58 = vpack.c.bf16 %v2013_v55, %v1989_v50  ;;  %v4491_v35 = vpack.c.bf16 %v2015_v49, %v1991_v52  ;;  %2802 = vmatprep.mubr.f32.mxu0 %v4601_v4  ;;  %2873 = vmatprep.mubr.f32.mxu1 %v4601_v4 }
 0x22d   :  { %v4485_v51 = vpack.c.bf16 %v2014_v57, %v1990_v56  ;;  %v4489_v36 = vpack.c.bf16 %v2016_v1, %v1992_v0 }
 0x22f   :  { %4486 = vmatprep.subr.bf16.mxu0 %v4485_v51  ;;  %4490 = vmatprep.subr.bf16.mxu1 %v4489_v36 }
 0x230   :  { %4488 = vmatpush1.bf16.msra.mxu0 %v4487_v58  ;;  %4492 = vmatpush1.bf16.msra.mxu1 %v4491_v35 }
 0x233   :  { %4307 = vmatmul.mubr.msk.f32.vlgmr.msra.gmra.mrb[82].mxu0 %vm2024_vm3, %v5210_v40  ;;  %4308 = vmatmul.mubr.msk.f32.vlgmr.msra.gmra.mrb[82].mxu1 %vm2024_vm3, %v5210_v40  ;;  %v2907_v40 = vld [vmem:[%s5526_s1 + $0x18] sm:$0x3f] }
 0x234   :  { %3122 = vmatprep.mubr.f32.mxu0 %v4601_v4  ;;  %3211 = vmatprep.mubr.f32.mxu1 %v4601_v4  ;;  %2915 = vst [vmem:[#allocation2 + $0x18] sm:$0x3f] %v2907_v40 }
 0x2ae   :  { %v2094_v8 = vpop.f32.mrb[72].mxu0  ;;  %v2165_v10 = vpop.f32.mrb[72].mxu1 }
 0x2af   :  { %v2095_v9 = vadd.f32 %v2094_v8, %v5312_v3  ;;  %v2166_v31 = vadd.f32 %v2165_v10, %v5312_v3  ;;  %v2096_v32 = vpop.f32.mrb[73].mxu0  ;;  %v2167_v17 = vpop.f32.mrb[73].mxu1 }
 0x2b0   :  { %v2097_v13 = vadd.f32 %v2096_v32, %v5312_v3  ;;  %v2168_v14 = vadd.f32 %v2167_v17, %v5312_v3 }
 0x2b1   :  { %v2880_v18 = vmax.f32 %v2095_v9, 0.0  ;;  %v2882_v48 = vmax.f32 %v2166_v31, 0.0 }
 0x2b2   :  { %v2881_v53 = vmax.f32 %v2097_v13, 0.0  ;;  %v2883_v54 = vmax.f32 %v2168_v14, 0.0 }
 0x2b3   :  { %v2920_v11 = vadd.f32 %v2882_v48, %v2880_v18 }
 0x2b4   :  { %v2921_v5 = vadd.f32 %v2883_v54, %v2881_v53 }
 0x2ce   :  { %v2236_v12 = vpop.f32.mrb[74].mxu0  ;;  %v2307_v15 = vpop.f32.mrb[74].mxu1 }
 0x2cf   :  { %v2237_v16 = vadd.f32 %v2236_v12, %v5312_v3  ;;  %v2238_v19 = vpop.f32.mrb[75].mxu0  ;;  %v2309_v20 = vpop.f32.mrb[75].mxu1  ;;  %v2308_v42 = vadd.f32 %v2307_v15, %v5312_v3 }
 0x2d0   :  { %v2239_v21 = vadd.f32 %v2238_v19, %v5312_v3  ;;  %v2310_v6 = vadd.f32 %v2309_v20, %v5312_v3 }
 0x2d1   :  { %v2884_v22 = vmax.f32 %v2237_v16, 0.0  ;;  %v2886_v0 = vmax.f32 %v2308_v42, 0.0 }
 0x2d2   :  { %v2885_v23 = vmax.f32 %v2239_v21, 0.0  ;;  %v2887_v1 = vmax.f32 %v2310_v6, 0.0 }
 0x2d3   :  { %v2922_v24 = vadd.f32 %v2920_v11, %v2884_v22 }
 0x2d4   :  { %v2923_v25 = vadd.f32 %v2921_v5, %v2885_v23 }
 0x2d5   :  { %v2926_v26 = vrot.slane %v2922_v24, 2 }
 0x2d6   :  { %v2927_v27 = vrot.slane %v2923_v25, 2 }
 0x2d7   :  { %2930 = vst [vmem:[#allocation2 + $0x40] ss:$-60 sps:$4 sm:$0xc7] %v2926_v26  }
 0x2d8   :  { %2931 = vst [vmem:[#allocation2 + $0x48] ss:$-60 sps:$4 sm:$0xc7] %v2927_v27  }
 0x2de   :  { %v2980_v28 = vld [vmem:[#allocation2] sm:$0xff] }
 0x2df   :  { %v2988_v37 = vld [vmem:[#allocation2 + $0x40] sm:$0x7]  ;;  %v2981_v29 = vld [vmem:[#allocation2 + $0x8] sm:$0xff] }
 0x2e0   :  { %v2989_v30 = vld [vmem:[#allocation2 + $0x48] sm:$0x7]  ;;  %v4496_v38 = vpack.c.bf16 %v2988_v37, %v2980_v28 }
 0x2e1   :  { %v4493_v34 = vpack.c.bf16 %v2989_v30, %v2981_v29 }
 0x2e3   :  { %4495 = vmatprep.subr.msk.bf16.mxu0 %vm5320_vm6, %v4493_v34 }
 0x2e4   :  { %4498 = vmatpush1.bf16.msk.msra.mxu0 %vm5320_vm6, %v4496_v38 }
 0x2e7   :  { %4311 = vmatmul.mubr.msk.f32.vlgmr.msra.gmra.mrb[84].mxu0 %vm3020_vm7, %v5331_v39 }
 0x2e8   :  { %3128 = vmatprep.mubr.f32.mxu0 %v4601_v4 }
 0x2eb   :  { %4312 = vmatmul.mubr.msk.f32.gmra.mrb[86].mxu0 %vm3020_vm7, %v5339_v41 }
 0x2ec   :  { %3134 = vmatprep.mubr.f32.mxu0 %v4601_v4 }
 0x2ee   :  { %v2378_v44 = vpop.f32.mrb[76].mxu0  ;;  %v2449_v7 = vpop.f32.mrb[76].mxu1 }
 0x2ef   :  { %4313 = vmatmul.mubr.msk.f32.gmra.mrb[88].mxu0 %vm3020_vm7, %v5347_v43  ;;  %v2379_v47 = vadd.f32 %v2378_v44, %v5312_v3  ;;  %v2450_v50 = vadd.f32 %v2449_v7, %v5312_v3  ;;  %v2380_v52 = vpop.f32.mrb[77].mxu0  ;;  %v2451_v55 = vpop.f32.mrb[77].mxu1 }
 0x2f0   :  { %3140 = vmatprep.mubr.f32.mxu0 %v4601_v4  ;;  %v2381_v49 = vadd.f32 %v2380_v52, %v5312_v3  ;;  %v2452_v56 = vadd.f32 %v2451_v55, %v5312_v3 }
 0x2f1   :  { %v2888_v57 = vmax.f32 %v2379_v47, 0.0  ;;  %v2890_v51 = vmax.f32 %v2450_v50, 0.0 }
 0x2f2   :  { %v2889_v58 = vmax.f32 %v2381_v49, 0.0  ;;  %v2891_v45 = vmax.f32 %v2452_v56, 0.0 }
 0x2f3   :  { %4314 = vmatmul.mubr.msk.f32.gmra.mrb[90].mxu0 %vm3020_vm7, %v5357_v46  ;;  %v2934_v35 = vadd.f32 %v2888_v57, %v2886_v0 }
 0x2f4   :  { %3300 = vmatprep.mubr.f32.mxu0 %v4601_v4  ;;  %v2935_v36 = vadd.f32 %v2889_v58, %v2887_v1 }
 0x2f5   :  { %v2936_v59 = vadd.f32 %v2934_v35, %v2890_v51 }
 0x2f6   :  { %v2937_v60 = vadd.f32 %v2935_v36, %v2891_v45  ;;  %v2520_v40 = vpop.f32.mrb[78].mxu0  ;;  %v2591_v61 = vpop.f32.mrb[78].mxu1 }
 0x2f7   :  { %v2940_v62 = vrot.slane %v2936_v59, 2  ;;  %v2521_v63 = vadd.f32 %v2520_v40, %v5312_v3  ;;  %v2592_v2 = vadd.f32 %v2591_v61, %v5312_v3  ;;  %v2522_v8 = vpop.f32.mrb[79].mxu0  ;;  %v2593_v10 = vpop.f32.mrb[79].mxu1 }
 0x2f8   :  { %v2941_v9 = vrot.slane %v2937_v60, 2  ;;  %v2523_v31 = vadd.f32 %v2522_v8, %v5312_v3  ;;  %v2594_v32 = vadd.f32 %v2593_v10, %v5312_v3 }
 0x2f9   :  { %2944 = vst [vmem:[#allocation2 + $0x50] ss:$-60 sps:$4 sm:$0xc7] %v2940_v62   ;;  %v2892_v17 = vmax.f32 %v2521_v63, 0.0  ;;  %v2894_v13 = vmax.f32 %v2592_v2, 0.0 }
 0x2fa   :  { %2945 = vst [vmem:[#allocation2 + $0x58] ss:$-60 sps:$4 sm:$0xc7] %v2941_v9   ;;  %v2893_v14 = vmax.f32 %v2523_v31, 0.0  ;;  %v2895_v18 = vmax.f32 %v2594_v32, 0.0 }
 0x2fb   :  { %v2948_v48 = vadd.f32 %v2894_v13, %v2892_v17  ;;  %v5426_v17 = vpop.permute.xlu1 %3002 }
 0x2fc   :  { %v2949_v53 = vadd.f32 %v2895_v18, %v2893_v14  ;;  %v5429_v14 = vpop.permute.xlu0 %3007 }
 0x2fe   :  { %v2662_v54 = vpop.f32.mrb[80].mxu0  ;;  %v2733_v11 = vpop.f32.mrb[80].mxu1 }
 0x2ff   :  { %v2663_v5 = vadd.f32 %v2662_v54, %v5312_v3  ;;  %v2664_v12 = vpop.f32.mrb[81].mxu0  ;;  %v2735_v15 = vpop.f32.mrb[81].mxu1  ;;  %v2734_v29 = vadd.f32 %v2733_v11, %v5312_v3 }
 0x300   :  { %v2665_v16 = vadd.f32 %v2664_v12, %v5312_v3  ;;  %v2982_v19 = vld [vmem:[#allocation2 + $0x10] sm:$0xff]  ;;  %v2736_v34 = vadd.f32 %v2735_v15, %v5312_v3 }
 0x301   :  { %v2990_v20 = vld [vmem:[#allocation2 + $0x50] sm:$0x7]  ;;  %v2896_v21 = vmax.f32 %v2663_v5, 0.0  ;;  %v2983_v22 = vld [vmem:[#allocation2 + $0x18] sm:$0xff]  ;;  %v2898_v55 = vmax.f32 %v2734_v29, 0.0 }
 0x302   :  { %v2991_v23 = vld [vmem:[#allocation2 + $0x58] sm:$0x7]  ;;  %v2897_v24 = vmax.f32 %v2665_v16, 0.0  ;;  %v4502_v27 = vpack.c.bf16 %v2990_v20, %v2982_v19  ;;  %v2899_v56 = vmax.f32 %v2736_v34, 0.0  ;;  %v5434_v19 = vpop.permute.xlu1 %3012 }
 0x303   :  { %v4499_v25 = vpack.c.bf16 %v2991_v23, %v2983_v22  ;;  %v2950_v26 = vadd.f32 %v2948_v48, %v2896_v21  ;;  %v5437_v22 = vpop.permute.xlu0 %3017 }
 0x304   :  { %v2951_v28 = vadd.f32 %v2949_v53, %v2897_v24 }
 0x305   :  { %4501 = vmatprep.subr.msk.bf16.mxu1 %vm5320_vm6, %v4499_v25  ;;  %v2954_v37 = vrot.slane %v2950_v26, 2 }
 0x306   :  { %4504 = vmatpush1.bf16.msk.msra.mxu1 %vm5320_vm6, %v4502_v27  ;;  %v2955_v30 = vrot.slane %v2951_v28, 2  ;;  %v2804_v38 = vpop.f32.mrb[82].mxu0  ;;  %v2875_v42 = vpop.f32.mrb[82].mxu1 }
 0x307   :  { %2958 = vst [vmem:[#allocation2 + $0x60] ss:$-60 sps:$4 sm:$0xc7] %v2954_v37   ;;  %v2805_v6 = vadd.f32 %v2804_v38, %v5312_v3  ;;  %v2876_v44 = vadd.f32 %v2875_v42, %v5312_v3  ;;  %v2806_v7 = vpop.f32.mrb[83].mxu0  ;;  %v2877_v47 = vpop.f32.mrb[83].mxu1  ;;  %v5445_v42 = vld [vmem:[%s5535_s10] sm:$0xff] }
 0x308   :  { %2959 = vst [vmem:[#allocation2 + $0x68] ss:$-60 sps:$4 sm:$0xc7] %v2955_v30   ;;  %v2807_v50 = vadd.f32 %v2806_v7, %v5312_v3  ;;  %v2878_v52 = vadd.f32 %v2877_v47, %v5312_v3 }
 0x309   :  { %4317 = vmatmul.mubr.msk.f32.vlgmr.msra.gmra.mrb[84].mxu1 %vm3020_vm7, %v5331_v39  ;;  %v2900_v49 = vmax.f32 %v2805_v6, 0.0  ;;  %v2902_v1 = vmax.f32 %v2876_v44, 0.0  ;;  %v5453_v6 = vld [vmem:[%s5535_s10 + $0x8] sm:$0xff] }
 0x30a   :  { %3217 = vmatprep.mubr.f32.mxu1 %v4601_v4  ;;  %v2901_v0 = vmax.f32 %v2807_v50, 0.0  ;;  %v2903_v35 = vmax.f32 %v2878_v52, 0.0 }
 0x30b   :  { %v2962_v57 = vadd.f32 %v2900_v49, %v2898_v55 }
 0x30c   :  { %v2963_v58 = vadd.f32 %v2901_v0, %v2899_v56 }
 0x30d   :  { %4318 = vmatmul.mubr.msk.f32.gmra.mrb[86].mxu1 %vm3020_vm7, %v5339_v41  ;;  %v2964_v51 = vadd.f32 %v2962_v57, %v2902_v1 }
 0x30e   :  { %3223 = vmatprep.mubr.f32.mxu1 %v4601_v4  ;;  %v2965_v3 = vadd.f32 %v2963_v58, %v2903_v35  ;;  %v2984_v36 = vld [vmem:[#allocation2 + $0x20] sm:$0xff] }
 0x30f   :  { %v2992_v45 = vld [vmem:[#allocation2 + $0x60] sm:$0x7]  ;;  %v2968_v59 = vrot.slane %v2964_v51, 2  ;;  %v2985_v60 = vld [vmem:[#allocation2 + $0x28] sm:$0xff] }
 0x310   :  { %v2993_v40 = vld [vmem:[#allocation2 + $0x68] sm:$0x7]  ;;  %v2969_v61 = vrot.slane %v2965_v3, 2  ;;  %v4508_v63 = vpack.c.bf16 %v2992_v45, %v2984_v36 }
 0x311   :  { %4319 = vmatmul.mubr.msk.f32.gmra.mrb[88].mxu1 %vm3020_vm7, %v5347_v43  ;;  %v4505_v62 = vpack.c.bf16 %v2993_v40, %v2985_v60  ;;  %2972 = vst [vmem:[#allocation2 + $0x70] ss:$-60 sps:$4 sm:$0xc7] %v2968_v59  }
 0x312   :  { %3229 = vmatprep.mubr.f32.mxu1 %v4601_v4  ;;  %2973 = vst [vmem:[#allocation2 + $0x78] ss:$-60 sps:$4 sm:$0xc7] %v2969_v61  }
 0x313   :  { %4507 = vmatprep.subr.msk.bf16.mxu0 %vm5320_vm6, %v4505_v62 }
 0x314   :  { %4510 = vmatpush1.bf16.msk.msra.mxu0 %vm5320_vm6, %v4508_v63 }
 0x315   :  { %4320 = vmatmul.mubr.msk.f32.gmra.mrb[90].mxu1 %vm3020_vm7, %v5357_v46 }
 0x316   :  { %3389 = vmatprep.mubr.f32.mxu1 %v4601_v4 }
 0x317   :  { %4323 = vmatmul.mubr.msk.f32.vlgmr.msra.gmra.mrb[92].mxu0 %vm3020_vm7, %v5331_v39 }
 0x318   :  { %3306 = vmatprep.mubr.f32.mxu0 %v4601_v4  ;;  %v2986_v2 = vld [vmem:[#allocation2 + $0x30] sm:$0xff] }
 0x319   :  { %v2994_v8 = vld [vmem:[#allocation2 + $0x70] sm:$0x7]  ;;  %v2987_v10 = vld [vmem:[#allocation2 + $0x38] sm:$0xff] }
 0x31a   :  { %v2995_v9 = vld [vmem:[#allocation2 + $0x78] sm:$0x7]  ;;  %v4514_v32 = vpack.c.bf16 %v2994_v8, %v2986_v2 }
 0x31b   :  { %4324 = vmatmul.mubr.msk.f32.gmra.mrb[94].mxu0 %vm3020_vm7, %v5339_v41  ;;  %v4511_v31 = vpack.c.bf16 %v2995_v9, %v2987_v10 }
 0x31c   :  { %3312 = vmatprep.mubr.f32.mxu0 %v4601_v4 }
 0x31d   :  { %4513 = vmatprep.subr.msk.bf16.mxu1 %vm5320_vm6, %v4511_v31 }
 0x31e   :  { %4516 = vmatpush1.bf16.msk.msra.mxu1 %vm5320_vm6, %v4514_v32 }
 0x31f   :  { %4325 = vmatmul.mubr.msk.f32.gmra.mrb[96].mxu0 %vm3020_vm7, %v5347_v43 }
 0x320   :  { %3318 = vmatprep.mubr.f32.mxu0 %v4601_v4 }
 0x321   :  { %4329 = vmatmul.mubr.msk.f32.vlgmr.msra.gmra.mrb[92].mxu1 %vm3020_vm7, %v5331_v39 }
 0x322   :  { %3395 = vmatprep.mubr.f32.mxu1 %v4601_v4 }
 0x323   :  { %4326 = vmatmul.mubr.msk.f32.gmra.mrb[98].mxu0 %vm3020_vm7, %v5357_v46 }
 0x324   :  { %3530 = vmatprep.mubr.f32.mxu0 %v4601_v4 }
 0x325   :  { %4330 = vmatmul.mubr.msk.f32.gmra.mrb[94].mxu1 %vm3020_vm7, %v5339_v41 }
 0x326   :  { %3401 = vmatprep.mubr.f32.mxu1 %v4601_v4 }
 0x329   :  { %4331 = vmatmul.mubr.msk.f32.gmra.mrb[96].mxu1 %vm3020_vm7, %v5347_v43 }
 0x32a   :  { %3407 = vmatprep.mubr.f32.mxu1 %v4601_v4 }
 0x32d   :  { %4332 = vmatmul.mubr.msk.f32.gmra.mrb[98].mxu1 %vm3020_vm7, %v5357_v46 }
 0x32e   :  { %3607 = vmatprep.mubr.f32.mxu1 %v4601_v4 }
 0x3ba   :  { %v3124_v33 = vpop.f32.mrb[84].mxu0 }
 0x3bb   :  { %v3126_v39 = vpop.f32.mrb[85].mxu0  ;;  %v3125_v13 = vadd.f32 %v3124_v33, %v5426_v17 }
 0x3bc   :  { %v3127_v41 = vadd.f32 %v3126_v39, %v5426_v17 }
 0x3bd   :  { %v3414_v54 = vmax.f32 %v3125_v13, 0.0 }
 0x3be   :  { %v3130_v18 = vpop.f32.mrb[86].mxu0  ;;  %v3415_v11 = vmax.f32 %v3127_v41, 0.0 }
 0x3bf   :  { %v3131_v43 = vadd.f32 %v3130_v18, %v5429_v14  ;;  %v3132_v48 = vpop.f32.mrb[87].mxu0 }
 0x3c0   :  { %v3133_v53 = vadd.f32 %v3132_v48, %v5429_v14 }
 0x3c1   :  { %v3422_v46 = vmax.f32 %v3131_v43, 0.0 }
 0x3c2   :  { %v3423_v5 = vmax.f32 %v3133_v53, 0.0  ;;  %v3136_v12 = vpop.f32.mrb[88].mxu0 }
 0x3c3   :  { %v4519_v15 = vpack.c.bf16 %v3422_v46, %v3414_v54  ;;  %v3138_v16 = vpop.f32.mrb[89].mxu0  ;;  %v3137_v21 = vadd.f32 %v3136_v12, %v5434_v19 }
 0x3c4   :  { %v4517_v20 = vpack.c.bf16 %v3423_v5, %v3415_v11  ;;  %v3139_v23 = vadd.f32 %v3138_v16, %v5434_v19 }
 0x3c5   :  { %v3430_v28 = vmax.f32 %v3137_v21, 0.0 }
 0x3c6   :  { %v3142_v24 = vpop.f32.mrb[90].mxu0  ;;  %4518 = vmatprep.subr.bf16.mxu0 %v4517_v20  ;;  %v3431_v29 = vmax.f32 %v3139_v23, 0.0 }
 0x3c7   :  { %v3143_v25 = vadd.f32 %v3142_v24, %v5437_v22  ;;  %v3144_v26 = vpop.f32.mrb[91].mxu0  ;;  %4520 = vmatpush1.bf16.msra.mxu0 %v4519_v15 }
 0x3c8   :  { %v3145_v27 = vadd.f32 %v3144_v26, %v5437_v22 }
 0x3c9   :  { %v3438_v37 = vmax.f32 %v3143_v25, 0.0 }
 0x3ca   :  { %v3439_v30 = vmax.f32 %v3145_v27, 0.0 }
 0x3cb   :  { %v4523_v34 = vpack.c.bf16 %v3438_v37, %v3430_v28 }
 0x3cc   :  { %v4521_v38 = vpack.c.bf16 %v3439_v30, %v3431_v29 }
 0x3ce   :  { %4522 = vmatprep.subr.bf16.mxu0 %v4521_v38 }
 0x3cf   :  { %4524 = vmatpush1.bf16.msra.mxu0 %v4523_v34 }
 0x3d2   :  { %4333 = vmatmul.mubr.msk.f32.vlgmr.msra.gmra.mrb[100].mxu0 %vm1038_vm2, %v5445_v42 }
 0x3d3   :  { %3536 = vmatprep.mubr.f32.mxu0 %v4601_v4 }
 0x3d6   :  { %4334 = vmatmul.mubr.msk.f32.gmra.mrb[102].mxu0 %vm1038_vm2, %v5453_v6 }
 0x3d7   :  { %3684 = vmatprep.mubr.f32.mxu0 %v4601_v4 }
 0x3dc   :  { %v3213_v44 = vpop.f32.mrb[84].mxu1 }
 0x3dd   :  { %v3215_v7 = vpop.f32.mrb[85].mxu1  ;;  %v3214_v47 = vadd.f32 %v3213_v44, %v5426_v17 }
 0x3de   :  { %v3216_v50 = vadd.f32 %v3215_v7, %v5426_v17 }
 0x3df   :  { %v3416_v0 = vmax.f32 %v3214_v47, 0.0 }
 0x3e0   :  { %v3219_v52 = vpop.f32.mrb[86].mxu1  ;;  %v3417_v1 = vmax.f32 %v3216_v50, 0.0 }
 0x3e1   :  { %v3220_v55 = vadd.f32 %v3219_v52, %v5429_v14  ;;  %v3221_v49 = vpop.f32.mrb[87].mxu1 }
 0x3e2   :  { %v3222_v56 = vadd.f32 %v3221_v49, %v5429_v14 }
 0x3e3   :  { %v3424_v57 = vmax.f32 %v3220_v55, 0.0 }
 0x3e4   :  { %v3425_v58 = vmax.f32 %v3222_v56, 0.0  ;;  %v3225_v35 = vpop.f32.mrb[88].mxu1 }
 0x3e5   :  { %v4527_v51 = vpack.c.bf16 %v3424_v57, %v3416_v0  ;;  %v3227_v3 = vpop.f32.mrb[89].mxu1  ;;  %v3226_v45 = vadd.f32 %v3225_v35, %v5434_v19 }
 0x3e6   :  { %v4525_v36 = vpack.c.bf16 %v3425_v58, %v3417_v1  ;;  %v3228_v59 = vadd.f32 %v3227_v3, %v5434_v19 }
 0x3e7   :  { %v3432_v2 = vmax.f32 %v3226_v45, 0.0 }
 0x3e8   :  { %v3231_v60 = vpop.f32.mrb[90].mxu1  ;;  %4526 = vmatprep.subr.bf16.mxu1 %v4525_v36  ;;  %v3433_v9 = vmax.f32 %v3228_v59, 0.0 }
 0x3e9   :  { %v3232_v40 = vadd.f32 %v3231_v60, %v5437_v22  ;;  %v3233_v61 = vpop.f32.mrb[91].mxu1  ;;  %4528 = vmatpush1.bf16.msra.mxu1 %v4527_v51 }
 0x3ea   :  { %v3234_v62 = vadd.f32 %v3233_v61, %v5437_v22  ;;  %v3302_v63 = vpop.f32.mrb[92].mxu0 }
 0x3eb   :  { %v3440_v8 = vmax.f32 %v3232_v40, 0.0  ;;  %v3304_v10 = vpop.f32.mrb[93].mxu0  ;;  %v3303_v33 = vadd.f32 %v3302_v63, %v5426_v17 }
 0x3ec   :  { %v3441_v31 = vmax.f32 %v3234_v62, 0.0  ;;  %v3305_v13 = vadd.f32 %v3304_v10, %v5426_v17  ;;  %v3453_v10 = vpop.permute.xlu1 %3452 }
 0x3ed   :  { %v4531_v32 = vpack.c.bf16 %v3440_v8, %v3432_v2  ;;  %v3418_v53 = vmax.f32 %v3303_v33, 0.0 }
 0x3ee   :  { %v4529_v39 = vpack.c.bf16 %v3441_v31, %v3433_v9  ;;  %v3308_v41 = vpop.f32.mrb[94].mxu0  ;;  %v3419_v46 = vmax.f32 %v3305_v13, 0.0  ;;  %v3458_v31 = vpop.permute.xlu0 %3457 }
 0x3ef   :  { %v3309_v18 = vadd.f32 %v3308_v41, %v5429_v14  ;;  %v3310_v43 = vpop.f32.mrb[95].mxu0 }
 0x3f0   :  { %v3311_v48 = vadd.f32 %v3310_v43, %v5429_v14  ;;  %4530 = vmatprep.subr.bf16.mxu1 %v4529_v39 }
 0x3f1   :  { %v3426_v54 = vmax.f32 %v3309_v18, 0.0  ;;  %4532 = vmatpush1.bf16.msra.mxu1 %v4531_v32 }
 0x3f2   :  { %v3427_v11 = vmax.f32 %v3311_v48, 0.0  ;;  %v3314_v5 = vpop.f32.mrb[96].mxu0 }
 0x3f3   :  { %v4535_v12 = vpack.c.bf16 %v3426_v54, %v3418_v53  ;;  %v3316_v15 = vpop.f32.mrb[97].mxu0  ;;  %v3315_v21 = vadd.f32 %v3314_v5, %v5434_v19 }
 0x3f4   :  { %v4533_v16 = vpack.c.bf16 %v3427_v11, %v3419_v46  ;;  %v3391_v20 = vpop.f32.mrb[92].mxu1  ;;  %4335 = vmatmul.mubr.msk.f32.vlgmr.msra.gmra.mrb[100].mxu1 %vm1038_vm2, %v5445_v42  ;;  %v3317_v24 = vadd.f32 %v3316_v15, %v5434_v19 }
 0x3f5   :  { %v3393_v23 = vpop.f32.mrb[93].mxu1  ;;  %3613 = vmatprep.mubr.f32.mxu1 %v4601_v4  ;;  %v3392_v26 = vadd.f32 %v3391_v20, %v5426_v17  ;;  %v3434_v34 = vmax.f32 %v3315_v21, 0.0 }
 0x3f6   :  { %v3320_v25 = vpop.f32.mrb[98].mxu0  ;;  %4534 = vmatprep.subr.bf16.mxu0 %v4533_v16  ;;  %v3394_v37 = vadd.f32 %v3393_v23, %v5426_v17  ;;  %v3435_v47 = vmax.f32 %v3317_v24, 0.0 }
 0x3f7   :  { %v3321_v27 = vadd.f32 %v3320_v25, %v5437_v22  ;;  %v3322_v28 = vpop.f32.mrb[99].mxu0  ;;  %4536 = vmatpush1.bf16.msra.mxu0 %v4535_v12  ;;  %v3420_v55 = vmax.f32 %v3392_v26, 0.0 }
 0x3f8   :  { %v3323_v29 = vadd.f32 %v3322_v28, %v5437_v22  ;;  %v3397_v30 = vpop.f32.mrb[94].mxu1  ;;  %4336 = vmatmul.mubr.msk.f32.gmra.mrb[102].mxu1 %vm1038_vm2, %v5453_v6  ;;  %v3421_v56 = vmax.f32 %v3394_v37, 0.0 }
 0x3f9   :  { %v3442_v38 = vmax.f32 %v3321_v27, 0.0  ;;  %v3398_v44 = vadd.f32 %v3397_v30, %v5429_v14  ;;  %v3399_v7 = vpop.f32.mrb[95].mxu1  ;;  %3761 = vmatprep.mubr.f32.mxu1 %v4601_v4 }
 0x3fa   :  { %v3443_v50 = vmax.f32 %v3323_v29, 0.0  ;;  %v3400_v52 = vadd.f32 %v3399_v7, %v5429_v14 }
 0x3fb   :  { %v4539_v49 = vpack.c.bf16 %v3442_v38, %v3434_v34  ;;  %v3428_v17 = vmax.f32 %v3398_v44, 0.0 }
 0x3fc   :  { %v4537_v0 = vpack.c.bf16 %v3443_v50, %v3435_v47  ;;  %v3429_v57 = vmax.f32 %v3400_v52, 0.0  ;;  %v3403_v1 = vpop.f32.mrb[96].mxu1 }
 0x3fd   :  { %v4543_v58 = vpack.c.bf16 %v3428_v17, %v3420_v55  ;;  %v3405_v35 = vpop.f32.mrb[97].mxu1  ;;  %v3404_v3 = vadd.f32 %v3403_v1, %v5434_v19 }
 0x3fe   :  { %v4541_v51 = vpack.c.bf16 %v3429_v57, %v3421_v56  ;;  %4538 = vmatprep.subr.bf16.mxu0 %v4537_v0  ;;  %v3406_v36 = vadd.f32 %v3405_v35, %v5434_v19 }
 0x3ff   :  { %4540 = vmatpush1.bf16.msra.mxu0 %v4539_v49  ;;  %v3436_v40 = vmax.f32 %v3404_v3, 0.0 }
 0x400   :  { %v3409_v45 = vpop.f32.mrb[98].mxu1  ;;  %4542 = vmatprep.subr.bf16.mxu1 %v4541_v51  ;;  %v3437_v62 = vmax.f32 %v3406_v36, 0.0 }
 0x401   :  { %v3410_v14 = vadd.f32 %v3409_v45, %v5437_v22  ;;  %v3411_v59 = vpop.f32.mrb[99].mxu1  ;;  %4544 = vmatpush1.bf16.msra.mxu1 %v4543_v58 }
 0x402   :  { %v3412_v60 = vadd.f32 %v3411_v59, %v5437_v22  ;;  %4337 = vmatmul.mubr.msk.f32.vlgmr.msra.gmra.mrb[104].mxu0 %vm1038_vm2, %v5445_v42 }
 0x403   :  { %v3444_v61 = vmax.f32 %v3410_v14, 0.0  ;;  %3690 = vmatprep.mubr.f32.mxu0 %v4601_v4 }
 0x404   :  { %v3445_v63 = vmax.f32 %v3412_v60, 0.0 }
 0x405   :  { %v4547_v2 = vpack.c.bf16 %v3444_v61, %v3436_v40 }
 0x406   :  { %v4545_v8 = vpack.c.bf16 %v3445_v63, %v3437_v62  ;;  %4338 = vmatmul.mubr.msk.f32.gmra.mrb[106].mxu0 %vm1038_vm2, %v5453_v6 }
 0x407   :  { %3864 = vmatprep.mubr.f32.mxu0 %v4601_v4 }
 0x408   :  { %4546 = vmatprep.subr.bf16.mxu1 %v4545_v8 }
 0x409   :  { %4548 = vmatpush1.bf16.msra.mxu1 %v4547_v2  ;;  %v3795_v2 = vpop.permute.xlu1 %3794 }
 0x40c   :  { %4339 = vmatmul.mubr.msk.f32.vlgmr.msra.gmra.mrb[104].mxu1 %vm1038_vm2, %v5445_v42 }
 0x40d   :  { %3767 = vmatprep.mubr.f32.mxu1 %v4601_v4 }
 0x410   :  { %4340 = vmatmul.mubr.msk.f32.gmra.mrb[106].mxu1 %vm1038_vm2, %v5453_v6  ;;  %v3790_v6 = vld [vmem:[%s5537_s12] sm:$0x3f] }
 0x411   :  { %3935 = vmatprep.mubr.f32.mxu1 %v4601_v4 }
 0x4a5   :  { %v3532_v19 = vpop.f32.mrb[100].mxu0 }
 0x4a6   :  { %v3534_v22 = vpop.f32.mrb[101].mxu0  ;;  %v3533_v9 = vadd.f32 %v3532_v19, %v3453_v10 }
 0x4a7   :  { %v3535_v32 = vadd.f32 %v3534_v22, %v3453_v10 }
 0x4a8   :  { %v3774_v18 = vmax.f32 %v3533_v9, 0.0 }
 0x4a9   :  { %v3538_v33 = vpop.f32.mrb[102].mxu0  ;;  %v3775_v42 = vmax.f32 %v3535_v32, 0.0 }
 0x4aa   :  { %v3539_v39 = vadd.f32 %v3538_v33, %v3458_v31  ;;  %v3540_v13 = vpop.f32.mrb[103].mxu0 }
 0x4ab   :  { %v3541_v41 = vadd.f32 %v3540_v13, %v3458_v31 }
 0x4ac   :  { %v3782_v43 = vmax.f32 %v3539_v39, 0.0 }
 0x4ad   :  { %v3783_v48 = vmax.f32 %v3541_v41, 0.0 }
 0x4ae   :  { %v4551_v53 = vpack.c.bf16 %v3782_v43, %v3774_v18 }
 0x4af   :  { %v4549_v54 = vpack.c.bf16 %v3783_v48, %v3775_v42 }
 0x4b1   :  { %4550 = vmatprep.subr.bf16.mxu0 %v4549_v54 }
 0x4b2   :  { %4552 = vmatpush1.bf16.msra.mxu0 %v4551_v53 }
 0x4b5   :  { %4341 = vmatmul.mubr.msk.f32.vlgmr.msra.gmra.mrb[108].mxu0 %vm2024_vm3, %v3790_v6 }
 0x4b6   :  { %4006 = vmatprep.mubr.f32.mxu0 %v4601_v4 }
 0x4c7   :  { %v3609_v46 = vpop.f32.mrb[100].mxu1 }
 0x4c8   :  { %v3611_v11 = vpop.f32.mrb[101].mxu1  ;;  %v3610_v5 = vadd.f32 %v3609_v46, %v3453_v10 }
 0x4c9   :  { %v3612_v12 = vadd.f32 %v3611_v11, %v3453_v10 }
 0x4ca   :  { %v3776_v23 = vmax.f32 %v3610_v5, 0.0 }
 0x4cb   :  { %v3615_v15 = vpop.f32.mrb[102].mxu1  ;;  %v3777_v25 = vmax.f32 %v3612_v12, 0.0 }
 0x4cc   :  { %v3616_v16 = vadd.f32 %v3615_v15, %v3458_v31  ;;  %v3617_v20 = vpop.f32.mrb[103].mxu1 }
 0x4cd   :  { %v3618_v21 = vadd.f32 %v3617_v20, %v3458_v31 }
 0x4ce   :  { %v3784_v24 = vmax.f32 %v3616_v16, 0.0 }
 0x4cf   :  { %v3785_v26 = vmax.f32 %v3618_v21, 0.0 }
 0x4d0   :  { %v4555_v27 = vpack.c.bf16 %v3784_v24, %v3776_v23  ;;  %v4098_v24 = vld [vmem:[%s5539_s14] sm:$0x3] }
 0x4d1   :  { %v4553_v28 = vpack.c.bf16 %v3785_v26, %v3777_v25  ;;  %v4103_v25 = vpop.permute.xlu0 %4102 }
 0x4d3   :  { %4554 = vmatprep.subr.bf16.mxu1 %v4553_v28 }
 0x4d4   :  { %4556 = vmatpush1.bf16.msra.mxu1 %v4555_v27 }
 0x4d5   :  { %v3686_v37 = vpop.f32.mrb[104].mxu0 }
 0x4d6   :  { %v3688_v29 = vpop.f32.mrb[105].mxu0  ;;  %v3687_v30 = vadd.f32 %v3686_v37, %v3453_v10 }
 0x4d7   :  { %4342 = vmatmul.mubr.msk.f32.vlgmr.msra.gmra.mrb[108].mxu1 %vm2024_vm3, %v3790_v6  ;;  %v3689_v34 = vadd.f32 %v3688_v29, %v3453_v10 }
 0x4d8   :  { %4077 = vmatprep.mubr.f32.mxu1 %v4601_v4  ;;  %v3778_v50 = vmax.f32 %v3687_v30, 0.0 }
 0x4d9   :  { %v3692_v38 = vpop.f32.mrb[106].mxu0  ;;  %v3779_v55 = vmax.f32 %v3689_v34, 0.0 }
 0x4da   :  { %v3693_v44 = vadd.f32 %v3692_v38, %v3458_v31  ;;  %v3694_v7 = vpop.f32.mrb[107].mxu0 }
 0x4db   :  { %v3695_v47 = vadd.f32 %v3694_v7, %v3458_v31 }
 0x4dc   :  { %v3786_v52 = vmax.f32 %v3693_v44, 0.0 }
 0x4dd   :  { %v3787_v49 = vmax.f32 %v3695_v47, 0.0 }
 0x4de   :  { %v4559_v17 = vpack.c.bf16 %v3786_v52, %v3778_v50 }
 0x4df   :  { %v4557_v56 = vpack.c.bf16 %v3787_v49, %v3779_v55  ;;  %v3763_v0 = vpop.f32.mrb[104].mxu1 }
 0x4e0   :  { %v3765_v57 = vpop.f32.mrb[105].mxu1  ;;  %v3764_v1 = vadd.f32 %v3763_v0, %v3453_v10 }
 0x4e1   :  { %4558 = vmatprep.subr.bf16.mxu0 %v4557_v56  ;;  %v3766_v58 = vadd.f32 %v3765_v57, %v3453_v10 }
 0x4e2   :  { %4560 = vmatpush1.bf16.msra.mxu0 %v4559_v17  ;;  %v3780_v45 = vmax.f32 %v3764_v1, 0.0 }
 0x4e3   :  { %v3769_v35 = vpop.f32.mrb[106].mxu1  ;;  %v3781_v59 = vmax.f32 %v3766_v58, 0.0 }
 0x4e4   :  { %v3770_v51 = vadd.f32 %v3769_v35, %v3458_v31  ;;  %v3771_v3 = vpop.f32.mrb[107].mxu1 }
 0x4e5   :  { %v3772_v36 = vadd.f32 %v3771_v3, %v3458_v31  ;;  %4343 = vmatmul.mubr.msk.f32.vlgmr.msra.gmra.mrb[110].mxu0 %vm2024_vm3, %v3790_v6 }
 0x4e6   :  { %v3788_v14 = vmax.f32 %v3770_v51, 0.0  ;;  %4180 = vmatprep.mubr.f32.mxu0 %v4601_v4 }
 0x4e7   :  { %v3789_v60 = vmax.f32 %v3772_v36, 0.0 }
 0x4e8   :  { %v4563_v40 = vpack.c.bf16 %v3788_v14, %v3780_v45 }
 0x4e9   :  { %v4561_v61 = vpack.c.bf16 %v3789_v60, %v3781_v59 }
 0x4eb   :  { %4562 = vmatprep.subr.bf16.mxu1 %v4561_v61 }
 0x4ec   :  { %4564 = vmatpush1.bf16.msra.mxu1 %v4563_v40 }
 0x4ef   :  { %4344 = vmatmul.mubr.msk.f32.vlgmr.msra.gmra.mrb[110].mxu1 %vm2024_vm3, %v3790_v6 }
 0x588   :  { %v3866_v62 = vpop.f32.mrb[108].mxu0 }
 0x589   :  { %v3868_v63 = vpop.f32.mrb[109].mxu0  ;;  %v3867_v8 = vadd.f32 %v3866_v62, %v3795_v2 }
 0x58a   :  { %v3869_v19 = vadd.f32 %v3868_v63, %v3795_v2 }
 0x58b   :  { %v4084_v32 = vmax.f32 %v3867_v8, 0.0 }
 0x58c   :  { %v4085_v4 = vmax.f32 %v3869_v19, 0.0 }
 0x5aa   :  { %v3937_v22 = vpop.f32.mrb[108].mxu1 }
 0x5ab   :  { %v3938_v10 = vadd.f32 %v3937_v22, %v3795_v2  ;;  %v3939_v9 = vpop.f32.mrb[109].mxu1 }
 0x5ac   :  { %v3940_v31 = vadd.f32 %v3939_v9, %v3795_v2 }
 0x5ad   :  { %v4086_v33 = vmax.f32 %v3938_v10, 0.0 }
 0x5ae   :  { %v4087_v39 = vmax.f32 %v3940_v31, 0.0 }
 0x5af   :  { %v4092_v13 = vadd.f32 %v4086_v33, %v4084_v32 }
 0x5b0   :  { %v4093_v41 = vadd.f32 %v4087_v39, %v4085_v4 }
 0x5b8   :  { %v4008_v18 = vpop.f32.mrb[110].mxu0 }
 0x5b9   :  { %v4009_v43 = vadd.f32 %v4008_v18, %v3795_v2  ;;  %v4010_v42 = vpop.f32.mrb[111].mxu0 }
 0x5ba   :  { %v4011_v48 = vadd.f32 %v4010_v42, %v3795_v2 }
 0x5bb   :  { %v4088_v53 = vmax.f32 %v4009_v43, 0.0 }
 0x5bc   :  { %v4089_v54 = vmax.f32 %v4011_v48, 0.0 }
 0x5bd   :  { %v4094_v6 = vadd.f32 %v4092_v13, %v4088_v53 }
 0x5be   :  { %v4095_v46 = vadd.f32 %v4093_v41, %v4089_v54 }
 0x5c2   :  { %v4079_v11 = vpop.f32.mrb[110].mxu1 }
 0x5c3   :  { %v4080_v5 = vadd.f32 %v4079_v11, %v3795_v2  ;;  %v4081_v12 = vpop.f32.mrb[111].mxu1 }
 0x5c4   :  { %v4082_v15 = vadd.f32 %v4081_v12, %v3795_v2 }
 0x5c5   :  { %v4090_v16 = vmax.f32 %v4080_v5, 0.0 }
 0x5c6   :  { %v4091_v20 = vmax.f32 %v4082_v15, 0.0 }
 0x5c7   :  { %v4096_v21 = vadd.f32 %v4094_v6, %v4090_v16 }
 0x5c8   :  { %v4097_v23 = vadd.f32 %v4095_v46, %v4091_v20 }
 0x5ca   :  { %4345 = vmatprep.subr.msk.mxu0 %vm4109_vm8, %v4097_v23 }
 0x5cb   :  { %4346 = vmatpush1.msk.msra.mxu0 %vm4109_vm8, %v4096_v21 }
 0x5cc   :  { %4347 = vmatmul.mubr.msk.f32.vlgmr.msra.gmra.mrb[112].mxu0 %vm4105_vm9, %v4098_v24 }
 0x69f   :  { %v4182_v26 = vpop.f32.mrb[112].mxu0 }
 0x6a0   :  { %v4183_v27 = vadd.f32 %v4182_v26, %v4103_v25  ;;  %v4184_v28 = vpop.f32.mrb[113].mxu0 }
 0x6a1   :  { %v4185_v37 = vadd.f32 %v4184_v28, %v4103_v25 }
 0x6a3   :  { %v4189_v29 = vcombine.low %v4183_v27, %v4185_v37 }
 0x6a5   :  { %4348 = vst.sshfl [vmem:[#allocation3] sm:$0x33 pattern:$0x76325410] %v4189_v29 }
 0x6a6   :  { %4588 = shalt.err (!%p4585_p4)
}
 0x6a7   :  { %s4589_s20 = scalar_lea.hbm %s5541_s16, 64 }
 0x6a8   :  { %p4590_p5 = scmp.ne.s32.totalorder %s5541_s16, %s4589_s20  ;;  %p4593_p6 = scmp.lt.u32.totalorder %s4589_s20, %s5541_s16 }
 0x6aa   :  { %p4595_p7 = pnand %p4593_p6, %p4590_p5 }
 0x6ac   :  { %4598 = shalt.err (!%p4595_p7)
}
 0x6ad   :  { %4208 = dma.vmem_to_hbm [thread:$0]  %s4206_s17, 64, %s5541_s16, [#allocation4]  }
 0x6ae   :  { %4599 = dma.done.wait [#allocation4], 64  }
 0x6af   :  { %4600 = vsyncadd [#allocation4], 4294967232 }
 0x6b0   :  { %4212 = vsyncpa [#allocation4], 1 }

</bundles_post_ra>
